<compile_context>
chip_gen: v5e
topology: v5e:2x2
jax: 0.10.0
libtpu: 0.0.40
codegen_flags: <defaults>
</compile_context>

<pallas_src>
import functools

import jax
import jax.numpy as jnp
from jax.experimental import pallas as pl
from jax.experimental.pallas import tpu as pltpu


# ----------------------------- fused SUBlock kernel -----------------------------
def _su_block_kernel(x_ref, skip_ref, wf_ref, bf_ref, wsu_ref, bsu_ref, bmap_ref, o_ref,
                     *, G, C, F, T, Cout, L, layers, compute_dtype):
    # x_ref, skip_ref : (G, F*T, C)        natural token-major activations (G batches)
    # wf_ref          : (3, C, 2C)         folded fusion conv weight, one slab per F-tap
    # bf_ref          : (1, 2C)            fusion conv bias (f32)
    # wsu_ref         : (C, L*Cout)        stacked SU (1x1 transposed-conv) weights
    # bsu_ref         : (L, 1, Cout)       SU biases (f32)
    # bmap_ref        : (F_out*T, Cout)    per-subband bias map for bias-only rows (f32)
    # o_ref           : (G, F_out*T, Cout) natural-layout output
    FT = F * T

    # Skip fusion in f32, then cast matmul operands to the MXU-native compute dtype.
    y3 = (x_ref[...] + skip_ref[...]).astype(compute_dtype)           # (G, F*T, C)

    # Conv taps along F = shifts by T rows *within each batch* (leading dim keeps the
    # batches separate, so nothing leaks across batch boundaries).  T-row blocks are
    # sublane-tile aligned, so these concats are cheap vreg selects (no lane splices).
    zblk = jnp.zeros((G, T, C), compute_dtype)
    y_prev3 = jnp.concatenate([zblk, y3[:, :FT - T, :]], axis=1)      # input at f-1
    y_next3 = jnp.concatenate([y3[:, T:, :], zblk], axis=1)           # input at f+1

    y = y3.reshape(G * FT, C)
    yp = y_prev3.reshape(G * FT, C)
    yn = y_next3.reshape(G * FT, C)

    # FusionLayer (3,1) conv: channel duplication already folded into wf; the three taps
    # are three accumulated MXU matmuls (no (.,3C) concat is materialized).
    z = (jnp.dot(yp, wf_ref[0], preferred_element_type=jnp.float32)
         + jnp.dot(y, wf_ref[1], preferred_element_type=jnp.float32)
         + jnp.dot(yn, wf_ref[2], preferred_element_type=jnp.float32))
    z = z + bf_ref[...]                                               # (G*FT, 2C), f32
    fused = z[:, :C] * jax.nn.sigmoid(z[:, C:])                       # GLU -> (G*FT, C)

    # Every SULayer channel matmul in one MXU pass.
    y_all = jnp.dot(fused.astype(compute_dtype), wsu_ref[...],
                    preferred_element_type=jnp.float32)               # (G*FT, L*Cout)
    y_all = y_all.reshape(G, FT, L * Cout)

    # ---- output assembly ----
    # 1) Prefill with the per-subband bias map: covers every bias-only row produced by
    #    the transposed-conv stride / output_padding (single full store).
    o_ref[...] = jnp.broadcast_to(bmap_ref[...][None], o_ref.shape).astype(o_ref.dtype)
    # 2) Overwrite data rows f_out = off + f_in*stride with static, T-row-aligned stores.
    for i, (s0, sd, st, off) in enumerate(layers):
        b_i = bsu_ref[i]                                              # (1, Cout)
        yi = y_all[:, s0 * T:(s0 + sd) * T, i * Cout:(i + 1) * Cout] + b_i
        if st == 1:
            o_ref[:, off * T:(off + sd) * T, :] = yi.astype(o_ref.dtype)
        else:
            for f in range(sd):
                r = (off + f * st) * T
                o_ref[:, r:r + T, :] = yi[:, f * T:(f + 1) * T, :].astype(o_ref.dtype)


# ----------------------------- SUBlock forward wrapper -----------------------------
def su_block_forward(x, x_skip, params, *, compute_dtype=jnp.bfloat16, batch_group=None):
    B, F, T, C = x.shape
    assert x_skip.shape == x.shape

    # FusionLayer weights: fold the torch `.repeat(1,1,1,2)` channel duplication.
    wf = params["fusion_w"]                                  # (3, 2C_in, 2C_out), tap-major
    bf = params["fusion_b"]                                  # (1, 2C_out)
    w_fold = (wf[:, :C, :] + wf[:, C:, :]).astype(compute_dtype)        # (3, C, 2C)
    b_fuse = bf.reshape(1, 2 * C).astype(jnp.float32)

    # SU layers: stack all channel matmuls/biases and build placement + bias-map metadata.
    su = params["su_layers"]
    L = len(su)
    Cout = su[0]["w"].shape[1]
    w_su = jnp.concatenate([lp["w"] for lp in su], axis=1).astype(compute_dtype)  # (C, L*Cout)
    b_su = jnp.stack([lp["b"].reshape(1, Cout) for lp in su], axis=0).astype(jnp.float32)

    meta, bias_rows, f_out = [], [], 0
    for lp in su:
        s0, s1 = lp["sd_interval"]
        sd, st, sbs = s1 - s0, lp["stride"], lp["subband_shape"]
        out_pad = sbs - ((sd - 1) * st + 1)                  # ConvTranspose output_padding
        assert 0 <= out_pad < st, "invalid subband/stride configuration"
        meta.append((s0, sd, st, f_out))
        bias_rows.append(jnp.broadcast_to(lp["b"].reshape(1, Cout), (sbs * T, Cout)))
        f_out += sbs
    bias_map = jnp.concatenate(bias_rows, axis=0).astype(jnp.float32)  # (F_out*T, Cout)

    # Batching: fewer, fatter grid steps.  Default = all batches in one step (best for the
    # single-TC v5e/v6e).  On v7x set batch_group=B//2 (or smaller) so the "parallel" grid
    # axis has >=2 steps for the two TensorCores, and to bound per-step VMEM at scale.
    G = B if batch_group is None else batch_group
    assert B % G == 0, "batch_group must divide the batch size"
    n_steps = B // G

    # Natural layout everywhere: only free reshapes, no HBM transpose round trips.
    x_r = x.reshape(B, F * T, C)
    s_r = x_skip.reshape(B, F * T, C)

    n_in, n_out = F * T, f_out * T
    flops = B * n_in * (2 * 3 * C * (2 * C) + 2 * C * (L * Cout) + 8 * C)
    bytes_accessed = (4 * (2 * B * n_in * C + B * n_out * Cout
                           + b_fuse.size + b_su.size + bias_map.size)
                      + jnp.dtype(compute_dtype).itemsize * (w_fold.size + w_su.size))

    kern = functools.partial(
        _su_block_kernel, G=G, C=C, F=F, T=T, Cout=Cout, L=L,
        layers=tuple(meta), compute_dtype=compute_dtype)

    out = pl.pallas_call(
        kern,
        out_shape=jax.ShapeDtypeStruct((B, n_out, Cout), x.dtype),
        grid=(n_steps,),
        in_specs=[
            pl.BlockSpec((G, n_in, C), lambda g: (g, 0, 0)),
            pl.BlockSpec((G, n_in, C), lambda g: (g, 0, 0)),
            pl.BlockSpec((3, C, 2 * C), lambda g: (0, 0, 0)),
            pl.BlockSpec((1, 2 * C), lambda g: (0, 0)),
            pl.BlockSpec((C, L * Cout), lambda g: (0, 0)),
            pl.BlockSpec((L, 1, Cout), lambda g: (0, 0, 0)),
            pl.BlockSpec((n_out, Cout), lambda g: (0, 0)),
        ],
        out_specs=pl.BlockSpec((G, n_out, Cout), lambda g: (g, 0, 0)),
        compiler_params=pltpu.CompilerParams(
            dimension_semantics=("parallel",),
            vmem_limit_bytes=32 * 1024 * 1024,
        ),
        cost_estimate=pl.CostEstimate(
            flops=int(flops), transcendentals=B * n_in * C,
            bytes_accessed=int(bytes_accessed)),
    )(x_r, s_r, w_fold, b_fuse, w_su, b_su, bias_map)

    return out.reshape(B, f_out, T, Cout)


# ----------------------------- pure-JAX f32 reference -----------------------------
def reference(x, x_skip, params):
    B, F, T, C = x.shape
    y = x + x_skip
    y2 = jnp.concatenate([y, y], axis=-1)
    ypad = jnp.pad(y2, ((0, 0), (1, 1), (0, 0), (0, 0)))
    w = params["fusion_w"]
    z = sum(jnp.einsum("bftc,cd->bftd", ypad[:, k:k + F], w[k]) for k in range(3))
    z = z + params["fusion_b"][0]
    fused = z[..., :C] * jax.nn.sigmoid(z[..., C:])

    outs = []
    for lp in params["su_layers"]:
        s0, s1 = lp["sd_interval"]
        st, sbs = lp["stride"], lp["subband_shape"]
        Cout = lp["w"].shape[1]
        xs = fused[:, s0:s1]
        yv = jnp.einsum("bftc,cd->bftd", xs, lp["w"]) + lp["b"][0]
        out = jnp.broadcast_to(lp["b"][0], (B, sbs, T, Cout))
        out = out.at[:, ::st].set(yv)
        outs.append(out)
    return jnp.concatenate(outs, axis=1)


# ----------------------------- main -----------------------------
if __name__ == "__main__":
    key = jax.random.PRNGKey(0)
    B, F, T, C = 2, 16, 8, 4          # (B, Fi-1, T, Ci-1)
    Cout = 4                          # output_dim

    upsample_strides = [1, 2, 4]
    subband_shapes = [4, 8, 32]
    sd_intervals = [(0, 4), (4, 8), (8, 16)]

    keys = jax.random.split(key, 10)
    x = jax.random.normal(keys[0], (B, F, T, C), jnp.float32)
    x_skip = jax.random.normal(keys[1], (B, F, T, C), jnp.float32)

    params = {
        # (k, 2C_in, 2C_out) tap-major conv weight; bias (1, 2C)
        "fusion_w": 0.2 * jax.random.normal(keys[2], (3, 2 * C, 2 * C), jnp.float32),
        "fusion_b": 0.1 * jax.random.normal(keys[3], (1, 2 * C), jnp.float32),
        "su_layers": [],
    }
    for i, (st, sbs, sdi) in enumerate(zip(upsample_strides, subband_shapes, sd_intervals)):
        sd = sdi[1] - sdi[0]
        out_pad = sbs - ((sd - 1) * st + 1)   # get_convtranspose_output_padding
        assert 0 <= out_pad < st, "invalid subband/stride configuration"
        wk = 0.2 * jax.random.normal(keys[4 + i], (C, Cout), jnp.float32)
        bk = 0.1 * jax.random.normal(jax.random.fold_in(keys[9], i), (1, Cout), jnp.float32)
        params["su_layers"].append(
            dict(w=wk, b=bk, sd_interval=sdi, stride=st, subband_shape=sbs)
        )

    ref = reference(x, x_skip, params)

    # Default fast path: bf16 matmul operands, f32 accumulation (tolerance reflects bf16).
    out_bf16 = jax.block_until_ready(su_block_forward(x, x_skip, params))
    assert out_bf16.shape == (B, sum(subband_shapes), T, Cout), out_bf16.shape
    assert jnp.allclose(out_bf16, ref, atol=6e-2, rtol=6e-2), "bf16 kernel mismatch vs reference"

    # f32-operand mode: tight numerical check of the fused-kernel semantics.
    out_f32 = jax.block_until_ready(
        su_block_forward(x, x_skip, params, compute_dtype=jnp.float32))
    assert out_f32.shape == (B, sum(subband_shapes), T, Cout), out_f32.shape
    assert jnp.allclose(out_f32, ref, atol=5e-4, rtol=5e-4), "f32 kernel mismatch vs reference"

    print("KERNEL_OK")
</pallas_src>

<mosaic_0001>
module attributes {stable_mosaic.version = 11 : i64} {
  func.func @_su_block_kernel(%arg0: i32, %arg1: memref<2x128x4xf32, #tpu.memory_space<vmem>>, %arg2: memref<2x128x4xf32, #tpu.memory_space<vmem>>, %arg3: memref<3x4x8xbf16, #tpu.memory_space<vmem>>, %arg4: memref<1x8xf32, #tpu.memory_space<vmem>>, %arg5: memref<4x12xbf16, #tpu.memory_space<vmem>>, %arg6: memref<3x1x4xf32, #tpu.memory_space<vmem>>, %arg7: memref<352x4xf32, #tpu.memory_space<vmem>>, %arg8: memref<2x352x4xf32, #tpu.memory_space<vmem>>) attributes {dimension_semantics = [#tpu.dimension_semantics<parallel>], iteration_bounds = array<i64: 1>, scalar_prefetch = 0 : i64, scratch_operands = 0 : i64, tpu.core_type = #tpu.core_type<tc>, window_params = [{transform_indices = @transform_0, window_bounds = array<i64: 2, 128, 4>}, {transform_indices = @transform_1, window_bounds = array<i64: 2, 128, 4>}, {pipeline_mode = #tpu.pipeline_mode<synchronous>, transform_indices = @transform_2, window_bounds = array<i64: 3, 4, 8>}, {pipeline_mode = #tpu.pipeline_mode<synchronous>, transform_indices = @transform_3, window_bounds = array<i64: 1, 8>}, {pipeline_mode = #tpu.pipeline_mode<synchronous>, transform_indices = @transform_4, window_bounds = array<i64: 4, 12>}, {pipeline_mode = #tpu.pipeline_mode<synchronous>, transform_indices = @transform_5, window_bounds = array<i64: 3, 1, 4>}, {pipeline_mode = #tpu.pipeline_mode<synchronous>, transform_indices = @transform_6, window_bounds = array<i64: 352, 4>}, {transform_indices = @transform_7, window_bounds = array<i64: 2, 352, 4>}]} {
    %c0 = arith.constant 0 : index
    %c0_0 = arith.constant 0 : index
    %c0_1 = arith.constant 0 : index
    %0 = vector.load %arg1[%c0, %c0_0, %c0_1] : memref<2x128x4xf32, #tpu.memory_space<vmem>>, vector<2x128x4xf32>
    %c0_2 = arith.constant 0 : index
    %c0_3 = arith.constant 0 : index
    %c0_4 = arith.constant 0 : index
    %1 = vector.load %arg2[%c0_2, %c0_3, %c0_4] : memref<2x128x4xf32, #tpu.memory_space<vmem>>, vector<2x128x4xf32>
    %2 = arith.addf %0, %1 : vector<2x128x4xf32>
    %3 = arith.truncf %2 : vector<2x128x4xf32> to vector<2x128x4xbf16>
    %cst = arith.constant 0.000000e+00 : bf16
    %4 = vector.broadcast %cst : bf16 to vector<2x8x4xbf16>
    %5 = vector.extract_strided_slice %3 {offsets = [0, 0, 0], sizes = [2, 120, 4], strides = [1, 1, 1]} : vector<2x128x4xbf16> to vector<2x120x4xbf16>
    %6 = tpu.concatenate %4, %5 in 1 : vector<2x8x4xbf16>, vector<2x120x4xbf16> -> vector<2x128x4xbf16>
    %7 = vector.extract_strided_slice %3 {offsets = [0, 8, 0], sizes = [2, 120, 4], strides = [1, 1, 1]} : vector<2x128x4xbf16> to vector<2x120x4xbf16>
    %8 = tpu.concatenate %7, %4 in 1 : vector<2x120x4xbf16>, vector<2x8x4xbf16> -> vector<2x128x4xbf16>
    %9 = vector.shape_cast %3 : vector<2x128x4xbf16> to vector<256x4xbf16>
    %10 = vector.shape_cast %6 : vector<2x128x4xbf16> to vector<256x4xbf16>
    %11 = vector.shape_cast %8 : vector<2x128x4xbf16> to vector<256x4xbf16>
    %c0_5 = arith.constant 0 : index
    %c0_6 = arith.constant 0 : index
    %c0_7 = arith.constant 0 : index
    %12 = vector.load %arg3[%c0_5, %c0_6, %c0_7] : memref<3x4x8xbf16, #tpu.memory_space<vmem>>, vector<1x4x8xbf16>
    %13 = vector.shape_cast %12 : vector<1x4x8xbf16> to vector<4x8xbf16>
    %cst_8 = arith.constant dense<0.000000e+00> : vector<256x8xf32>
    %14 = tpu.matmul %10, %13, %cst_8 {dimension_numbers = #tpu.dot_dimension_numbers<[1], [0], [0], [1], [0, 0, 1, 1], [], []>} : vector<256x4xbf16>, vector<4x8xbf16>, vector<256x8xf32> -> vector<256x8xf32>
    %c1 = arith.constant 1 : index
    %c0_9 = arith.constant 0 : index
    %c0_10 = arith.constant 0 : index
    %15 = vector.load %arg3[%c1, %c0_9, %c0_10] : memref<3x4x8xbf16, #tpu.memory_space<vmem>>, vector<1x4x8xbf16>
    %16 = vector.shape_cast %15 : vector<1x4x8xbf16> to vector<4x8xbf16>
    %cst_11 = arith.constant dense<0.000000e+00> : vector<256x8xf32>
    %17 = tpu.matmul %9, %16, %cst_11 {dimension_numbers = #tpu.dot_dimension_numbers<[1], [0], [0], [1], [0, 0, 1, 1], [], []>} : vector<256x4xbf16>, vector<4x8xbf16>, vector<256x8xf32> -> vector<256x8xf32>
    %18 = arith.addf %14, %17 : vector<256x8xf32>
    %c2 = arith.constant 2 : index
    %c0_12 = arith.constant 0 : index
    %c0_13 = arith.constant 0 : index
    %19 = vector.load %arg3[%c2, %c0_12, %c0_13] : memref<3x4x8xbf16, #tpu.memory_space<vmem>>, vector<1x4x8xbf16>
    %20 = vector.shape_cast %19 : vector<1x4x8xbf16> to vector<4x8xbf16>
    %cst_14 = arith.constant dense<0.000000e+00> : vector<256x8xf32>
    %21 = tpu.matmul %11, %20, %cst_14 {dimension_numbers = #tpu.dot_dimension_numbers<[1], [0], [0], [1], [0, 0, 1, 1], [], []>} : vector<256x4xbf16>, vector<4x8xbf16>, vector<256x8xf32> -> vector<256x8xf32>
    %22 = arith.addf %18, %21 : vector<256x8xf32>
    %c0_15 = arith.constant 0 : index
    %c0_16 = arith.constant 0 : index
    %23 = vector.load %arg4[%c0_15, %c0_16] : memref<1x8xf32, #tpu.memory_space<vmem>>, vector<1x8xf32>
    %24 = vector.broadcast %23 : vector<1x8xf32> to vector<256x8xf32>
    %25 = arith.addf %22, %24 : vector<256x8xf32>
    %26 = vector.extract_strided_slice %25 {offsets = [0, 0], sizes = [256, 4], strides = [1, 1]} : vector<256x8xf32> to vector<256x4xf32>
    %27 = vector.extract_strided_slice %25 {offsets = [0, 4], sizes = [256, 4], strides = [1, 1]} : vector<256x8xf32> to vector<256x4xf32>
    %28 = arith.negf %27 : vector<256x4xf32>
    %29 = math.exp %28 : vector<256x4xf32>
    %cst_17 = arith.constant 1.000000e+00 : f32
    %30 = vector.broadcast %cst_17 : f32 to vector<256x4xf32>
    %31 = arith.addf %30, %29 : vector<256x4xf32>
    %32 = arith.divf %30, %31 : vector<256x4xf32>
    %33 = arith.mulf %26, %32 : vector<256x4xf32>
    %34 = arith.truncf %33 : vector<256x4xf32> to vector<256x4xbf16>
    %c0_18 = arith.constant 0 : index
    %c0_19 = arith.constant 0 : index
    %35 = vector.load %arg5[%c0_18, %c0_19] : memref<4x12xbf16, #tpu.memory_space<vmem>>, vector<4x12xbf16>
    %cst_20 = arith.constant dense<0.000000e+00> : vector<256x12xf32>
    %36 = tpu.matmul %34, %35, %cst_20 {dimension_numbers = #tpu.dot_dimension_numbers<[1], [0], [0], [1], [0, 0, 1, 1], [], []>} : vector<256x4xbf16>, vector<4x12xbf16>, vector<256x12xf32> -> vector<256x12xf32>
    %37 = vector.shape_cast %36 : vector<256x12xf32> to vector<2x128x12xf32>
    %c0_21 = arith.constant 0 : index
    %c0_22 = arith.constant 0 : index
    %38 = vector.load %arg7[%c0_21, %c0_22] : memref<352x4xf32, #tpu.memory_space<vmem>>, vector<352x4xf32>
    %39 = vector.shape_cast %38 : vector<352x4xf32> to vector<1x352x4xf32>
    %40 = vector.shape_cast %39 : vector<1x352x4xf32> to vector<1x352x4xf32>
    %41 = vector.broadcast %40 : vector<1x352x4xf32> to vector<2x352x4xf32>
    %c0_23 = arith.constant 0 : index
    %c0_24 = arith.constant 0 : index
    %c0_25 = arith.constant 0 : index
    %42 = vector.load %arg8[%c0_23, %c0_24, %c0_25] : memref<2x352x4xf32, #tpu.memory_space<vmem>>, vector<2x352x4xf32>
    tpu.vector_store %arg8[%c0_23, %c0_24, %c0_25], %41 {strides = array<i32>} : memref<2x352x4xf32, #tpu.memory_space<vmem>>, vector<2x352x4xf32>,
    %c0_26 = arith.constant 0 : index
    %c0_27 = arith.constant 0 : index
    %c0_28 = arith.constant 0 : index
    %43 = vector.load %arg6[%c0_26, %c0_27, %c0_28] : memref<3x1x4xf32, #tpu.memory_space<vmem>>, vector<1x1x4xf32>
    %44 = vector.shape_cast %43 : vector<1x1x4xf32> to vector<1x4xf32>
    %45 = vector.extract_strided_slice %37 {offsets = [0, 0, 0], sizes = [2, 32, 4], strides = [1, 1, 1]} : vector<2x128x12xf32> to vector<2x32x4xf32>
    %46 = vector.shape_cast %44 : vector<1x4xf32> to vector<1x1x4xf32>
    %47 = vector.broadcast %46 : vector<1x1x4xf32> to vector<2x32x4xf32>
    %48 = arith.addf %45, %47 : vector<2x32x4xf32>
    %c0_29 = arith.constant 0 : index
    %c0_30 = arith.constant 0 : index
    %c0_31 = arith.constant 0 : index
    %49 = vector.load %arg8[%c0_29, %c0_30, %c0_31] : memref<2x352x4xf32, #tpu.memory_space<vmem>>, vector<2x32x4xf32>
    tpu.vector_store %arg8[%c0_29, %c0_30, %c0_31], %48 {strides = array<i32>} : memref<2x352x4xf32, #tpu.memory_space<vmem>>, vector<2x32x4xf32>,
    %c1_32 = arith.constant 1 : index
    %c0_33 = arith.constant 0 : index
    %c0_34 = arith.constant 0 : index
    %50 = vector.load %arg6[%c1_32, %c0_33, %c0_34] : memref<3x1x4xf32, #tpu.memory_space<vmem>>, vector<1x1x4xf32>
    %51 = vector.shape_cast %50 : vector<1x1x4xf32> to vector<1x4xf32>
    %52 = vector.extract_strided_slice %37 {offsets = [0, 32, 4], sizes = [2, 32, 4], strides = [1, 1, 1]} : vector<2x128x12xf32> to vector<2x32x4xf32>
    %53 = vector.shape_cast %51 : vector<1x4xf32> to vector<1x1x4xf32>
    %54 = vector.broadcast %53 : vector<1x1x4xf32> to vector<2x32x4xf32>
    %55 = arith.addf %52, %54 : vector<2x32x4xf32>
    %56 = vector.extract_strided_slice %55 {offsets = [0, 0, 0], sizes = [2, 8, 4], strides = [1, 1, 1]} : vector<2x32x4xf32> to vector<2x8x4xf32>
    %c0_35 = arith.constant 0 : index
    %c32 = arith.constant 32 : index
    %c0_36 = arith.constant 0 : index
    %57 = vector.load %arg8[%c0_35, %c32, %c0_36] : memref<2x352x4xf32, #tpu.memory_space<vmem>>, vector<2x8x4xf32>
    tpu.vector_store %arg8[%c0_35, %c32, %c0_36], %56 {strides = array<i32>} : memref<2x352x4xf32, #tpu.memory_space<vmem>>, vector<2x8x4xf32>,
    %58 = vector.extract_strided_slice %55 {offsets = [0, 8, 0], sizes = [2, 8, 4], strides = [1, 1, 1]} : vector<2x32x4xf32> to vector<2x8x4xf32>
    %c0_37 = arith.constant 0 : index
    %c48 = arith.constant 48 : index
    %c0_38 = arith.constant 0 : index
    %59 = vector.load %arg8[%c0_37, %c48, %c0_38] : memref<2x352x4xf32, #tpu.memory_space<vmem>>, vector<2x8x4xf32>
    tpu.vector_store %arg8[%c0_37, %c48, %c0_38], %58 {strides = array<i32>} : memref<2x352x4xf32, #tpu.memory_space<vmem>>, vector<2x8x4xf32>,
    %60 = vector.extract_strided_slice %55 {offsets = [0, 16, 0], sizes = [2, 8, 4], strides = [1, 1, 1]} : vector<2x32x4xf32> to vector<2x8x4xf32>
    %c0_39 = arith.constant 0 : index
    %c64 = arith.constant 64 : index
    %c0_40 = arith.constant 0 : index
    %61 = vector.load %arg8[%c0_39, %c64, %c0_40] : memref<2x352x4xf32, #tpu.memory_space<vmem>>, vector<2x8x4xf32>
    tpu.vector_store %arg8[%c0_39, %c64, %c0_40], %60 {strides = array<i32>} : memref<2x352x4xf32, #tpu.memory_space<vmem>>, vector<2x8x4xf32>,
    %62 = vector.extract_strided_slice %55 {offsets = [0, 24, 0], sizes = [2, 8, 4], strides = [1, 1, 1]} : vector<2x32x4xf32> to vector<2x8x4xf32>
    %c0_41 = arith.constant 0 : index
    %c80 = arith.constant 80 : index
    %c0_42 = arith.constant 0 : index
    %63 = vector.load %arg8[%c0_41, %c80, %c0_42] : memref<2x352x4xf32, #tpu.memory_space<vmem>>, vector<2x8x4xf32>
    tpu.vector_store %arg8[%c0_41, %c80, %c0_42], %62 {strides = array<i32>} : memref<2x352x4xf32, #tpu.memory_space<vmem>>, vector<2x8x4xf32>,
    %c2_43 = arith.constant 2 : index
    %c0_44 = arith.constant 0 : index
    %c0_45 = arith.constant 0 : index
    %64 = vector.load %arg6[%c2_43, %c0_44, %c0_45] : memref<3x1x4xf32, #tpu.memory_space<vmem>>, vector<1x1x4xf32>
    %65 = vector.shape_cast %64 : vector<1x1x4xf32> to vector<1x4xf32>
    %66 = vector.extract_strided_slice %37 {offsets = [0, 64, 8], sizes = [2, 64, 4], strides = [1, 1, 1]} : vector<2x128x12xf32> to vector<2x64x4xf32>
    %67 = vector.shape_cast %65 : vector<1x4xf32> to vector<1x1x4xf32>
    %68 = vector.broadcast %67 : vector<1x1x4xf32> to vector<2x64x4xf32>
    %69 = arith.addf %66, %68 : vector<2x64x4xf32>
    %70 = vector.extract_strided_slice %69 {offsets = [0, 0, 0], sizes = [2, 8, 4], strides = [1, 1, 1]} : vector<2x64x4xf32> to vector<2x8x4xf32>
    %c0_46 = arith.constant 0 : index
    %c96 = arith.constant 96 : index
    %c0_47 = arith.constant 0 : index
    %71 = vector.load %arg8[%c0_46, %c96, %c0_47] : memref<2x352x4xf32, #tpu.memory_space<vmem>>, vector<2x8x4xf32>
    tpu.vector_store %arg8[%c0_46, %c96, %c0_47], %70 {strides = array<i32>} : memref<2x352x4xf32, #tpu.memory_space<vmem>>, vector<2x8x4xf32>,
    %72 = vector.extract_strided_slice %69 {offsets = [0, 8, 0], sizes = [2, 8, 4], strides = [1, 1, 1]} : vector<2x64x4xf32> to vector<2x8x4xf32>
    %c0_48 = arith.constant 0 : index
    %c128 = arith.constant 128 : index
    %c0_49 = arith.constant 0 : index
    %73 = vector.load %arg8[%c0_48, %c128, %c0_49] : memref<2x352x4xf32, #tpu.memory_space<vmem>>, vector<2x8x4xf32>
    tpu.vector_store %arg8[%c0_48, %c128, %c0_49], %72 {strides = array<i32>} : memref<2x352x4xf32, #tpu.memory_space<vmem>>, vector<2x8x4xf32>,
    %74 = vector.extract_strided_slice %69 {offsets = [0, 16, 0], sizes = [2, 8, 4], strides = [1, 1, 1]} : vector<2x64x4xf32> to vector<2x8x4xf32>
    %c0_50 = arith.constant 0 : index
    %c160 = arith.constant 160 : index
    %c0_51 = arith.constant 0 : index
    %75 = vector.load %arg8[%c0_50, %c160, %c0_51] : memref<2x352x4xf32, #tpu.memory_space<vmem>>, vector<2x8x4xf32>
    tpu.vector_store %arg8[%c0_50, %c160, %c0_51], %74 {strides = array<i32>} : memref<2x352x4xf32, #tpu.memory_space<vmem>>, vector<2x8x4xf32>,
    %76 = vector.extract_strided_slice %69 {offsets = [0, 24, 0], sizes = [2, 8, 4], strides = [1, 1, 1]} : vector<2x64x4xf32> to vector<2x8x4xf32>
    %c0_52 = arith.constant 0 : index
    %c192 = arith.constant 192 : index
    %c0_53 = arith.constant 0 : index
    %77 = vector.load %arg8[%c0_52, %c192, %c0_53] : memref<2x352x4xf32, #tpu.memory_space<vmem>>, vector<2x8x4xf32>
    tpu.vector_store %arg8[%c0_52, %c192, %c0_53], %76 {strides = array<i32>} : memref<2x352x4xf32, #tpu.memory_space<vmem>>, vector<2x8x4xf32>,
    %78 = vector.extract_strided_slice %69 {offsets = [0, 32, 0], sizes = [2, 8, 4], strides = [1, 1, 1]} : vector<2x64x4xf32> to vector<2x8x4xf32>
    %c0_54 = arith.constant 0 : index
    %c224 = arith.constant 224 : index
    %c0_55 = arith.constant 0 : index
    %79 = vector.load %arg8[%c0_54, %c224, %c0_55] : memref<2x352x4xf32, #tpu.memory_space<vmem>>, vector<2x8x4xf32>
    tpu.vector_store %arg8[%c0_54, %c224, %c0_55], %78 {strides = array<i32>} : memref<2x352x4xf32, #tpu.memory_space<vmem>>, vector<2x8x4xf32>,
    %80 = vector.extract_strided_slice %69 {offsets = [0, 40, 0], sizes = [2, 8, 4], strides = [1, 1, 1]} : vector<2x64x4xf32> to vector<2x8x4xf32>
    %c0_56 = arith.constant 0 : index
    %c256 = arith.constant 256 : index
    %c0_57 = arith.constant 0 : index
    %81 = vector.load %arg8[%c0_56, %c256, %c0_57] : memref<2x352x4xf32, #tpu.memory_space<vmem>>, vector<2x8x4xf32>
    tpu.vector_store %arg8[%c0_56, %c256, %c0_57], %80 {strides = array<i32>} : memref<2x352x4xf32, #tpu.memory_space<vmem>>, vector<2x8x4xf32>,
    %82 = vector.extract_strided_slice %69 {offsets = [0, 48, 0], sizes = [2, 8, 4], strides = [1, 1, 1]} : vector<2x64x4xf32> to vector<2x8x4xf32>
    %c0_58 = arith.constant 0 : index
    %c288 = arith.constant 288 : index
    %c0_59 = arith.constant 0 : index
    %83 = vector.load %arg8[%c0_58, %c288, %c0_59] : memref<2x352x4xf32, #tpu.memory_space<vmem>>, vector<2x8x4xf32>
    tpu.vector_store %arg8[%c0_58, %c288, %c0_59], %82 {strides = array<i32>} : memref<2x352x4xf32, #tpu.memory_space<vmem>>, vector<2x8x4xf32>,
    %84 = vector.extract_strided_slice %69 {offsets = [0, 56, 0], sizes = [2, 8, 4], strides = [1, 1, 1]} : vector<2x64x4xf32> to vector<2x8x4xf32>
    %c0_60 = arith.constant 0 : index
    %c320 = arith.constant 320 : index
    %c0_61 = arith.constant 0 : index
    %85 = vector.load %arg8[%c0_60, %c320, %c0_61] : memref<2x352x4xf32, #tpu.memory_space<vmem>>, vector<2x8x4xf32>
    tpu.vector_store %arg8[%c0_60, %c320, %c0_61], %84 {strides = array<i32>} : memref<2x352x4xf32, #tpu.memory_space<vmem>>, vector<2x8x4xf32>,
    return
  }
  func.func @transform_0(%arg0: i32) -> (i32, i32, i32) {
    %c0_i32 = arith.constant 0 : i32
    %c0_i32_0 = arith.constant 0 : i32
    %c0_i32_1 = arith.constant 0 : i32
    return %arg0, %c0_i32, %c0_i32_0 : i32, i32, i32
  }
  func.func @transform_1(%arg0: i32) -> (i32, i32, i32) {
    %c0_i32 = arith.constant 0 : i32
    %c0_i32_0 = arith.constant 0 : i32
    %c0_i32_1 = arith.constant 0 : i32
    return %arg0, %c0_i32, %c0_i32_0 : i32, i32, i32
  }
  func.func @transform_2(%arg0: i32) -> (i32, i32, i32) {
    %c0_i32 = arith.constant 0 : i32
    %c0_i32_0 = arith.constant 0 : i32
    %c0_i32_1 = arith.constant 0 : i32
    %c0_i32_2 = arith.constant 0 : i32
    return %c0_i32, %c0_i32_0, %c0_i32_1 : i32, i32, i32
  }
  func.func @transform_3(%arg0: i32) -> (i32, i32) {
    %c0_i32 = arith.constant 0 : i32
    %c0_i32_0 = arith.constant 0 : i32
    %c0_i32_1 = arith.constant 0 : i32
    return %c0_i32, %c0_i32_0 : i32, i32
  }
  func.func @transform_4(%arg0: i32) -> (i32, i32) {
    %c0_i32 = arith.constant 0 : i32
    %c0_i32_0 = arith.constant 0 : i32
    %c0_i32_1 = arith.constant 0 : i32
    return %c0_i32, %c0_i32_0 : i32, i32
  }
  func.func @transform_5(%arg0: i32) -> (i32, i32, i32) {
    %c0_i32 = arith.constant 0 : i32
    %c0_i32_0 = arith.constant 0 : i32
    %c0_i32_1 = arith.constant 0 : i32
    %c0_i32_2 = arith.constant 0 : i32
    return %c0_i32, %c0_i32_0, %c0_i32_1 : i32, i32, i32
  }
  func.func @transform_6(%arg0: i32) -> (i32, i32) {
    %c0_i32 = arith.constant 0 : i32
    %c0_i32_0 = arith.constant 0 : i32
    %c0_i32_1 = arith.constant 0 : i32
    return %c0_i32, %c0_i32_0 : i32, i32
  }
  func.func @transform_7(%arg0: i32) -> (i32, i32, i32) {
    %c0_i32 = arith.constant 0 : i32
    %c0_i32_0 = arith.constant 0 : i32
    %c0_i32_1 = arith.constant 0 : i32
    return %arg0, %c0_i32, %c0_i32_0 : i32, i32, i32
  }
}

</mosaic_0001>

<bundles_post_ra>
// kernel: tpu_custom_call.1
= control target key start
LH: loop header
LB: loop body
LE: loop exit
PB: predicated region body
PF: predicated region fallthrough
CT: control target
= control target key end

     0   :  { %vm315_vm0 = vcmask 1041408   ;;  %vm231_vm1 = vcmask 1043456   ;;  %vm266_vm2 = vcmask 31744   ;;  %s2189_s9 = smov 4   ;;  %s2191_s30 = smov 120   ;;  %s3550_s2 = inlined_call_operand.vmem [shape: bf16[3,4,8], index: 2, kind: input, shape index: {}]   ;;  %s3551_s0 = inlined_call_operand.vmem [shape: f32[2,128,4], index: 0, kind: input, shape index: {}]   ;;  %s3552_s1 = inlined_call_operand.vmem [shape: f32[2,128,4], index: 1, kind: input, shape index: {}]   ;;  %s3553_s3 = inlined_call_operand.vmem [shape: f32[1,8], index: 3, kind: input, shape index: {}]   ;;  %s3554_s4 = inlined_call_operand.vmem [shape: bf16[4,12], index: 4, kind: input, shape index: {}]   ;;  %s3555_s5 = inlined_call_operand.vmem [shape: f32[3,1,4], index: 5, kind: input, shape index: {}]   ;;  %s3556_s6 = inlined_call_operand.vmem [shape: f32[352,4], index: 6, kind: input, shape index: {}]   ;;  %s3557_s7 = inlined_call_operand.vmem [shape: f32[2,352,4], index: 7, kind: output, shape index: {}]  }
   0x1   :  { %v1951_v0 = vld [vmem:[%s3550_s2 + $0x2] sm:$0x3]  ;;  %v1984_v1 = vld [vmem:[%s3550_s2 + $0x4] sm:$0x3]  ;;  %v247_v2 = vld [vmem:[%s3550_s2] sm:$0x3] }
   0x2   :  { %v317_v3 = vsel %vm315_vm0, %v1951_v0, 0  ;;  %v553_v4 = vsel %vm315_vm0, %v1984_v1, 0  ;;  %v455_v5 = vsel %vm315_vm0, %v247_v2, 0  ;;  %v27_v6 = vld [vmem:[%s3551_s0] sm:$0xff]  ;;  %v28_v7 = vld [vmem:[%s3551_s0 + $0x8] sm:$0xff]  ;;  %v29_v11 = vld [vmem:[%s3551_s0 + $0x10] sm:$0xff] }
   0x3   :  { %v59_v8 = vld [vmem:[%s3552_s1] sm:$0xff]  ;;  %326 = vmatpush.bf16.msra.mxu0 %v317_v3  ;;  %562 = vmatpush.bf16.msra.mxu2 %v553_v4  ;;  %v60_v9 = vld [vmem:[%s3552_s1 + $0x8] sm:$0xff]  ;;  %v61_v12 = vld [vmem:[%s3552_s1 + $0x10] sm:$0xff]  ;;  %s2188_s2 = smov 124  }
   0x4   :  { %v91_v10 = vadd.f32 %v59_v8, %v27_v6  ;;  %464 = vmatpush.bf16.msra.mxu1 %v455_v5  ;;  %v92_v13 = vadd.f32 %v60_v9, %v28_v7  ;;  %v93_v14 = vadd.f32 %v61_v12, %v29_v11  ;;  %v30_v21 = vld [vmem:[%s3551_s0 + $0x18] sm:$0xff]  ;;  %v31_v24 = vld [vmem:[%s3551_s0 + $0x20] sm:$0xff]  ;;  %v32_v37 = vld [vmem:[%s3551_s0 + $0x28] sm:$0xff] }
   0x5   :  { %v62_v23 = vld [vmem:[%s3552_s1 + $0x18] sm:$0xff]  ;;  %v63_v25 = vld [vmem:[%s3552_s1 + $0x20] sm:$0xff]  ;;  %v64_v38 = vld [vmem:[%s3552_s1 + $0x28] sm:$0xff] }
   0x6   :  { %v123_v15 = vpack.c.bf16 %v91_v10, %v91_v10  ;;  %v124_v16 = vpack.c.bf16 %v92_v13, %v92_v13  ;;  %v125_v17 = vpack.c.bf16 %v93_v14, %v93_v14  ;;  %v94_v29 = vadd.f32 %v62_v23, %v30_v21  ;;  %v33_v39 = vld [vmem:[%s3551_s0 + $0x30] sm:$0xff]  ;;  %v34_v49 = vld [vmem:[%s3551_s0 + $0x38] sm:$0xff]  ;;  %v35_v51 = vld [vmem:[%s3551_s0 + $0x40] sm:$0xff] }
   0x7   :  { %v95_v30 = vadd.f32 %v63_v25, %v31_v24  ;;  %v65_v40 = vld [vmem:[%s3552_s1 + $0x30] sm:$0xff]  ;;  %v96_v41 = vadd.f32 %v64_v38, %v32_v37  ;;  %v66_v50 = vld [vmem:[%s3552_s1 + $0x38] sm:$0xff]  ;;  %v67_v52 = vld [vmem:[%s3552_s1 + $0x40] sm:$0xff] }
   0x8   :  { %v185_v18 = vunpack.c.l.b16 %v123_v15  ;;  %v186_v19 = vunpack.c.l.b16 %v124_v16  ;;  %v187_v20 = vunpack.c.l.b16 %v125_v17  ;;  %v126_v31 = vpack.c.bf16 %v94_v29, %v94_v29  ;;  %v36_v61 = vld [vmem:[%s3551_s0 + $0x48] sm:$0xff]  ;;  %v37_v63 = vld [vmem:[%s3551_s0 + $0x50] sm:$0xff]  ;;  %v38_v9 = vld [vmem:[%s3551_s0 + $0x58] sm:$0xff] }
   0x9   :  { %v127_v32 = vpack.c.bf16 %v95_v30, %v95_v30  ;;  %v97_v42 = vadd.f32 %v65_v40, %v33_v39  ;;  %v128_v43 = vpack.c.bf16 %v96_v41, %v96_v41  ;;  %v98_v53 = vadd.f32 %v66_v50, %v34_v49  ;;  %v68_v62 = vld [vmem:[%s3552_s1 + $0x48] sm:$0xff]  ;;  %v69_v0 = vld [vmem:[%s3552_s1 + $0x50] sm:$0xff]  ;;  %v70_v10 = vld [vmem:[%s3552_s1 + $0x58] sm:$0xff] }
   0xa   :  { %v215_v22 = vpack.c.b16 %v185_v18, %v185_v18  ;;  %v250_v26 = vpack.c.b16 %v186_v19, %v185_v18  ;;  %v216_v27 = vpack.c.b16 %v187_v20, %v186_v19  ;;  %v188_v33 = vunpack.c.l.b16 %v126_v31  ;;  %v39_v11 = vld [vmem:[%s3551_s0 + $0x60] sm:$0xff]  ;;  %v40_v21 = vld [vmem:[%s3551_s0 + $0x68] sm:$0xff]  ;;  %v41_v23 = vld [vmem:[%s3551_s0 + $0x70] sm:$0xff] }
   0xb   :  { %v189_v34 = vunpack.c.l.b16 %v127_v32  ;;  %v129_v44 = vpack.c.bf16 %v97_v42, %v97_v42  ;;  %v190_v45 = vunpack.c.l.b16 %v128_v43  ;;  %v99_v54 = vadd.f32 %v67_v52, %v35_v51  ;;  %v71_v12 = vld [vmem:[%s3552_s1 + $0x60] sm:$0xff]  ;;  %v73_v24 = vld [vmem:[%s3552_s1 + $0x70] sm:$0xff]  ;;  %v42_v31 = vld [vmem:[%s3551_s0 + $0x78] sm:$0xff] }
   0xc   :  { %v234_v28 = vsel %vm231_vm1, 0, %v215_v22  ;;  %1952 = vmatmul.msk.bf16.vlgmr.msra.gmra.mxu0 %vm266_vm2, %v250_v26  ;;  %1985 = vmatmul.msk.bf16.vlgmr.msra.gmra.mxu2 %vm266_vm2, %v216_v27  ;;  %v251_v35 = vpack.c.b16 %v188_v33, %v187_v20  ;;  %v130_v55 = vpack.c.bf16 %v98_v53, %v98_v53  ;;  %v100_v1 = vadd.f32 %v68_v62, %v36_v61  ;;  %v72_v22 = vld [vmem:[%s3552_s1 + $0x68] sm:$0xff]  ;;  %v74_v32 = vld [vmem:[%s3552_s1 + $0x78] sm:$0xff]  ;;  %v43_v39 = vld [vmem:[%s3551_s0 + $0x80] sm:$0xff] }
   0xd   :  { %1968 = vmatmul.msk.bf16.vlgmr.msra.gmra.mxu1 %vm266_vm2, %v234_v28  ;;  %v217_v36 = vpack.c.b16 %v189_v34, %v188_v33  ;;  %v191_v46 = vunpack.c.l.b16 %v129_v44  ;;  %v252_v47 = vpack.c.b16 %v190_v45, %v189_v34  ;;  %v131_v56 = vpack.c.bf16 %v99_v54, %v99_v54  ;;  %v75_v40 = vld [vmem:[%s3552_s1 + $0x80] sm:$0xff]  ;;  %v44_v42 = vld [vmem:[%s3551_s0 + $0x88] sm:$0xff]  ;;  %v78_v61 = vld [vmem:[%s3552_s1 + $0x98] sm:$0xff] }
   0xe   :  { %v192_v57 = vunpack.c.l.b16 %v130_v55  ;;  %v101_v2 = vadd.f32 %v69_v0, %v37_v63  ;;  %v132_v3 = vpack.c.bf16 %v100_v1, %v100_v1  ;;  %v102_v13 = vadd.f32 %v70_v10, %v38_v9  ;;  %v76_v44 = vld [vmem:[%s3552_s1 + $0x88] sm:$0xff]  ;;  %v47_v62 = vld [vmem:[%s3551_s0 + $0xa0] sm:$0xff] }
   0xf   :  { %v218_v48 = vpack.c.b16 %v191_v46, %v190_v45  ;;  %v193_v58 = vunpack.c.l.b16 %v131_v56  ;;  %v103_v14 = vadd.f32 %v71_v12, %v39_v11  ;;  %v104_v25 = vadd.f32 %v72_v22, %v40_v21  ;;  %v45_v45 = vld [vmem:[%s3551_s0 + $0x90] sm:$0xff]  ;;  %v79_v63 = vld [vmem:[%s3552_s1 + $0xa0] sm:$0xff]  ;;  %v48_v21 = vld [vmem:[%s3551_s0 + $0xa8] sm:$0xff] }
  0x10   :  { %v253_v59 = vpack.c.b16 %v192_v57, %v191_v46  ;;  %v133_v4 = vpack.c.bf16 %v101_v2, %v101_v2  ;;  %v194_v5 = vunpack.c.l.b16 %v132_v3  ;;  %v134_v15 = vpack.c.bf16 %v102_v13, %v102_v13  ;;  %v77_v46 = vld [vmem:[%s3552_s1 + $0x90] sm:$0xff] }
  0x11   :  { %v219_v60 = vpack.c.b16 %v193_v58, %v192_v57  ;;  %v135_v16 = vpack.c.bf16 %v103_v14, %v103_v14  ;;  %v105_v26 = vadd.f32 %v73_v24, %v41_v23  ;;  %v109_v49 = vadd.f32 %v77_v46, %v45_v45  ;;  %v80_v23 = vld [vmem:[%s3552_s1 + $0xa8] sm:$0xff]  ;;  %v49_v24 = vld [vmem:[%s3551_s0 + $0xb0] sm:$0xff] }
  0x12   :  { %v195_v6 = vunpack.c.l.b16 %v133_v4  ;;  %v254_v7 = vpack.c.b16 %v194_v5, %v193_v58  ;;  %v196_v17 = vunpack.c.l.b16 %v134_v15  ;;  %v111_v4 = vadd.f32 %v79_v63, %v47_v62 }
  0x13   :  { %v197_v18 = vunpack.c.l.b16 %v135_v16  ;;  %v137_v28 = vpack.c.bf16 %v105_v26, %v105_v26  ;;  %v141_v52 = vpack.c.bf16 %v109_v49, %v109_v49 }
  0x14   :  { %v220_v8 = vpack.c.b16 %v195_v6, %v194_v5  ;;  %v255_v19 = vpack.c.b16 %v196_v17, %v195_v6  ;;  %v2403_v5 = vld [vmem:[%s3553_s3] ss:$0 sm:$0xff]  ;;  %v143_v9 = vpack.c.bf16 %v111_v4, %v111_v4 }
  0x15   :  { %v221_v20 = vpack.c.b16 %v197_v18, %v196_v17  ;;  %v199_v30 = vunpack.c.l.b16 %v137_v28  ;;  %v202_v55 = vunpack.c.l.b16 %v141_v52 }
  0x16   :  { %v2409_v15 = vunpack.c.l.b16 %v143_v9 }
  0x1c   :  { %1953 = vmatmul.msk.bf16.gmra.mxu0 %vm266_vm2, %v251_v35  ;;  %1986 = vmatmul.msk.bf16.gmra.mxu2 %vm266_vm2, %v217_v36  ;;  %v106_v35 = vadd.f32 %v74_v32, %v42_v31  ;;  %v112_v31 = vadd.f32 %v80_v23, %v48_v21 }
  0x1d   :  { %1969 = vmatmul.msk.bf16.gmra.mxu1 %vm266_vm2, %v216_v27  ;;  %v136_v27 = vpack.c.bf16 %v104_v25, %v104_v25  ;;  %v81_v25 = vld [vmem:[%s3552_s1 + $0xb0] sm:$0xff] }
  0x1e   :  { %v113_v32 = vadd.f32 %v81_v25, %v49_v24 }
  0x1f   :  { %v198_v29 = vunpack.c.l.b16 %v136_v27 }
  0x21   :  { %v256_v33 = vpack.c.b16 %v198_v29, %v197_v18  ;;  %v222_v34 = vpack.c.b16 %v199_v30, %v198_v29 }
  0x2c   :  { %1954 = vmatmul.msk.bf16.gmra.mxu0 %vm266_vm2, %v252_v47  ;;  %1987 = vmatmul.msk.bf16.gmra.mxu2 %vm266_vm2, %v218_v48  ;;  %v107_v47 = vadd.f32 %v75_v40, %v43_v39 }
  0x2d   :  { %1970 = vmatmul.msk.bf16.gmra.mxu1 %vm266_vm2, %v217_v36  ;;  %v138_v36 = vpack.c.bf16 %v106_v35, %v106_v35 }
  0x2e   :  { %v139_v50 = vpack.c.bf16 %v107_v47, %v107_v47 }
  0x2f   :  { %v239_v37 = vunpack.c.l.b16 %v138_v36  ;;  %v144_v36 = vpack.c.bf16 %v112_v31, %v112_v31 }
  0x30   :  { %v200_v53 = vunpack.c.l.b16 %v139_v50  ;;  %v50_v50 = vld [vmem:[%s3551_s0 + $0xb8] sm:$0xff] }
  0x31   :  { %v241_v38 = vpack.c.b16 %v239_v37, %v239_v37  ;;  %v257_v41 = vpack.c.b16 %v239_v37, %v199_v30  ;;  %v145_v37 = vpack.c.bf16 %v113_v32, %v113_v32 }
  0x32   :  { %v223_v56 = vpack.c.b16 %v200_v53, %v200_v53 }
  0x33   :  { %v244_v43 = vsel %vm231_vm1, %v241_v38, 0 }
  0x34   :  { %v236_v1 = vsel %vm231_vm1, 0, %v223_v56  ;;  %v51_v56 = vld [vmem:[%s3551_s0 + $0xc0] sm:$0xff] }
  0x3c   :  { %1955 = vmatmul.msk.bf16.gmra.mxu0 %vm266_vm2, %v253_v59  ;;  %1988 = vmatmul.msk.bf16.gmra.mxu2 %vm266_vm2, %v219_v60  ;;  %v46_v59 = vld [vmem:[%s3551_s0 + $0x98] sm:$0xff] }
  0x3d   :  { %1971 = vmatmul.msk.bf16.gmra.mxu1 %vm266_vm2, %v218_v48  ;;  %v108_v48 = vadd.f32 %v76_v44, %v44_v42  ;;  %v110_v3 = vadd.f32 %v78_v61, %v46_v59  ;;  %v2438_v44 = vunpack.c.l.b16 %v145_v37 }
  0x3f   :  { %v140_v51 = vpack.c.bf16 %v108_v48, %v108_v48 }
  0x41   :  { %v201_v54 = vunpack.c.l.b16 %v140_v51 }
  0x43   :  { %v258_v57 = vpack.c.b16 %v201_v54, %v200_v53  ;;  %v224_v58 = vpack.c.b16 %v202_v55, %v201_v54 }
  0x4c   :  { %1956 = vmatmul.msk.bf16.gmra.mxu0 %vm266_vm2, %v254_v7  ;;  %1989 = vmatmul.msk.bf16.gmra.mxu2 %vm266_vm2, %v220_v8 }
  0x4d   :  { %1972 = vmatmul.msk.bf16.gmra.mxu1 %vm266_vm2, %v219_v60 }
  0x5c   :  { %1957 = vmatmul.msk.bf16.gmra.mxu0 %vm266_vm2, %v255_v19  ;;  %1990 = vmatmul.msk.bf16.gmra.mxu2 %vm266_vm2, %v221_v20 }
  0x5d   :  { %1973 = vmatmul.msk.bf16.gmra.mxu1 %vm266_vm2, %v220_v8  ;;  %v142_v8 = vpack.c.bf16 %v110_v3, %v110_v3 }
  0x5f   :  { %v203_v14 = vunpack.c.l.b16 %v142_v8 }
  0x61   :  { %v259_v19 = vpack.c.b16 %v203_v14, %v202_v55  ;;  %v82_v55 = vld [vmem:[%s3552_s1 + $0xb8] sm:$0xff] }
  0x6c   :  { %1958 = vmatmul.msk.bf16.gmra.mxu0 %vm266_vm2, %v256_v33  ;;  %1991 = vmatmul.msk.bf16.gmra.mxu2 %vm266_vm2, %v222_v34 }
  0x6d   :  { %1974 = vmatmul.msk.bf16.gmra.mxu1 %vm266_vm2, %v221_v20  ;;  %v2412_v20 = vpack.c.b16 %v2409_v15, %v203_v14 }
  0x7c   :  { %1959 = vmatmul.msk.bf16.gmra.mxu0 %vm266_vm2, %v257_v41  ;;  %1992 = vmatmul.msk.bf16.gmra.mxu2 %vm266_vm2, %v244_v43  ;;  %v205_v43 = vunpack.c.l.b16 %v144_v36 }
  0x7d   :  { %1975 = vmatmul.msk.bf16.gmra.mxu1 %vm266_vm2, %v222_v34 }
  0x7e   :  { %v260_v52 = vpack.c.b16 %v205_v43, %v2409_v15  ;;  %v2448_v53 = vpack.c.b16 %v2438_v44, %v205_v43 }
  0x89   :  { %v328_v60 = vpop.f32.mrf.mxu0 }
  0x8a   :  { %v466_v0 = vpop.f32.mrf.mxu1 }
  0x8b   :  { %v467_v2 = vadd.f32 %v466_v0, %v328_v60  ;;  %v114_v0 = vadd.f32 %v82_v55, %v50_v50 }
  0x8c   :  { %1960 = vmatmul.msk.bf16.gmra.mxu0 %vm266_vm2, %v258_v57  ;;  %1993 = vmatmul.msk.bf16.gmra.mxu2 %vm266_vm2, %v224_v58  ;;  %v83_v57 = vld [vmem:[%s3552_s1 + $0xc0] sm:$0xff] }
  0x8d   :  { %1976 = vmatmul.msk.bf16.gmra.mxu1 %vm266_vm2, %v236_v1  ;;  %v115_v1 = vadd.f32 %v83_v57, %v51_v56  ;;  %v146_v15 = vpack.c.bf16 %v114_v0, %v114_v0 }
  0x8f   :  { %v564_v6 = vpop.f32.mrf.mxu2  ;;  %v207_v25 = vunpack.c.l.b16 %v146_v15 }
  0x90   :  { %v644_v7 = vadd.f32 %v564_v6, %v467_v2 }
  0x91   :  { %v330_v10 = vpop.f32.mrf.mxu0 }
  0x92   :  { %v2406_v11 = vadd.f32 %v2403_v5, %v644_v7  ;;  %v468_v12 = vpop.f32.mrf.mxu1 }
  0x93   :  { %v469_v16 = vadd.f32 %v468_v12, %v330_v10 }
  0x94   :  { %v2001_v13 = vmul.f32 -1.442695, %v2406_v11 }
  0x96   :  { %2059 = vpow2.f32 %v2001_v13 }
  0x97   :  { %v566_v17 = vpop.f32.mrf.mxu2 }
  0x98   :  { %v645_v18 = vadd.f32 %v566_v17, %v469_v16 }
  0x99   :  { %v333_v22 = vpop.f32.mrf.mxu0 }
  0x9a   :  { %v2427_v26 = vadd.f32 %v2403_v5, %v645_v18  ;;  %v471_v27 = vpop.f32.mrf.mxu1  ;;  %v147_v18 = vpack.c.bf16 %v115_v1, %v115_v1 }
  0x9b   :  { %v472_v30 = vadd.f32 %v471_v27, %v333_v22 }
  0x9c   :  { %v2060_v28 = vpop.eup %2059  ;;  %v2002_v29 = vmul.f32 -1.442695, %v2427_v26  ;;  %1961 = vmatmul.msk.bf16.gmra.mxu0 %vm266_vm2, %v259_v19  ;;  %1994 = vmatmul.msk.bf16.gmra.mxu2 %vm266_vm2, %v2412_v20 }
  0x9d   :  { %v808_v33 = vadd.f32 1.0, %v2060_v28  ;;  %1977 = vmatmul.msk.bf16.gmra.mxu1 %vm266_vm2, %v224_v58 }
  0x9e   :  { %2061 = vpow2.f32 %v2002_v29 }
  0x9f   :  { %2063 = vrcp.f32 %v808_v33  ;;  %v569_v34 = vpop.f32.mrf.mxu2  ;;  %v851_v59 = vand.u32 2147483648, %v808_v33  ;;  %v849_v63 = vand.u32 2147483647, %v808_v33  ;;  %vm845_vm4 = vweird.f32 %v808_v33 }
  0xa0   :  { %v646_v35 = vadd.f32 %v569_v34, %v472_v30  ;;  %v2480_v30 = vunpack.c.l.b16 %v147_v18 }
  0xa1   :  { %v335_v38 = vpop.f32.mrf.mxu0  ;;  %v852_v9 = vor.u32 1.1754944e-38, %v851_v59  ;;  %vm850_vm6 = vcmp.eq.f32.partialorder %v849_v63, 8.507059e+37 }
  0xa2   :  { %v2435_v39 = vadd.f32 %v2403_v5, %v646_v35  ;;  %v473_v40 = vpop.f32.mrf.mxu1  ;;  %v2492_v43 = vpack.c.b16 %v2480_v30, %v207_v25 }
  0xa3   :  { %v474_v47 = vadd.f32 %v473_v40, %v335_v38  ;;  %v52_v40 = vld [vmem:[%s3551_s0 + $0xc8] sm:$0xff] }
  0xa4   :  { %v2062_v41 = vpop.eup %2061  ;;  %v2003_v42 = vmul.f32 -1.442695, %v2435_v39 }
  0xa5   :  { %v2064_v45 = vpop.eup %2063  ;;  %v2440_v46 = vadd.f32 1.0, %v2062_v41 }
  0xa6   :  { %2065 = vpow2.f32 %v2003_v42  ;;  %v841_v48 = vmul.f32 %v2064_v45, %v808_v33  ;;  %vm846_vm3 = vweird.f32 %v2064_v45  ;;  %v261_v42 = vpack.c.b16 %v207_v25, %v2438_v44 }
  0xa7   :  { %2067 = vrcp.f32 %v2440_v46  ;;  %v571_v49 = vpop.f32.mrf.mxu2  ;;  %vm847_vm5 = vmor %vm845_vm4, %vm846_vm3  ;;  %v866_v21 = vand.u32 2147483648, %v2440_v46  ;;  %vm860_vm8 = vweird.f32 %v2440_v46 }
  0xa8   :  { %v647_v51 = vadd.f32 %v571_v49, %v474_v47  ;;  %v842_v54 = vsub.f32 1.0, %v841_v48  ;;  %v53_v47 = vld [vmem:[%s3551_s0 + $0xd0] sm:$0xff] }
  0xa9   :  { %v338_v58 = vpop.f32.mrf.mxu0  ;;  %v867_v33 = vor.u32 1.1754944e-38, %v866_v21  ;;  %v85_v48 = vld [vmem:[%s3552_s1 + $0xd0] sm:$0xff] }
  0xaa   :  { %v2460_v60 = vadd.f32 %v2403_v5, %v647_v51  ;;  %v476_v61 = vpop.f32.mrf.mxu1  ;;  %v843_v62 = vmul.f32 %v2064_v45, %v842_v54  ;;  %v117_v56 = vadd.f32 %v85_v48, %v53_v47 }
  0xab   :  { %v477_v4 = vadd.f32 %v476_v61, %v338_v58 }
  0xac   :  { %v2066_v2 = vpop.eup %2065  ;;  %v2004_v3 = vmul.f32 -1.442695, %v2460_v60  ;;  %1962 = vmatmul.msk.bf16.gmra.mxu0 %vm266_vm2, %v260_v52  ;;  %1995 = vmatmul.msk.bf16.gmra.mxu2 %vm266_vm2, %v2448_v53  ;;  %v844_v6 = vadd.f32 %v2064_v45, %v843_v62 }
  0xad   :  { %v2068_v7 = vpop.eup %2067  ;;  %v2466_v8 = vadd.f32 1.0, %v2066_v2  ;;  %1978 = vmatmul.msk.bf16.gmra.mxu1 %vm266_vm2, %v2412_v20  ;;  %v864_v20 = vand.u32 2147483647, %v2440_v46 }
  0xae   :  { %2069 = vpow2.f32 %v2004_v3  ;;  %v848_v10 = vsel %vm847_vm5, %v2064_v45, %v844_v6  ;;  %v856_v12 = vmul.f32 %v2068_v7, %v2440_v46  ;;  %vm861_vm7 = vweird.f32 %v2068_v7  ;;  %v84_v46 = vld [vmem:[%s3552_s1 + $0xc8] sm:$0xff] }
  0xaf   :  { %2071 = vrcp.f32 %v2466_v8  ;;  %v574_v13 = vpop.f32.mrf.mxu2  ;;  %v853_v14 = vsel %vm850_vm6, %v852_v9, %v848_v10  ;;  %vm862_vm9 = vmor %vm860_vm8, %vm861_vm7  ;;  %vm865_vm10 = vcmp.eq.f32.partialorder %v864_v20, 8.507059e+37  ;;  %v881_v50 = vand.u32 2147483648, %v2466_v8 }
  0xb0   :  { %v648_v16 = vadd.f32 %v574_v13, %v477_v4  ;;  %1352 = vrot.lane.b32.xlu0 %v853_v14, %s2188_s2  ;;  %v857_v17 = vsub.f32 1.0, %v856_v12  ;;  %v879_v54 = vand.u32 2147483647, %v2466_v8  ;;  %v116_v55 = vadd.f32 %v84_v46, %v52_v40  ;;  %v87_v40 = vld [vmem:[%s3552_s1 + $0xe0] sm:$0xff] }
  0xb1   :  { %v340_v19 = vpop.f32.mrf.mxu0  ;;  %vm875_vm12 = vweird.f32 %v2466_v8  ;;  %v882_v0 = vor.u32 1.1754944e-38, %v881_v50  ;;  %v149_v9 = vpack.c.bf16 %v117_v56, %v117_v56 }
  0xb2   :  { %v2476_v22 = vadd.f32 %v2403_v5, %v648_v16  ;;  %v478_v23 = vpop.f32.mrf.mxu1  ;;  %v858_v24 = vmul.f32 %v2068_v7, %v857_v17  ;;  %vm880_vm14 = vcmp.eq.f32.partialorder %v879_v54, 8.507059e+37  ;;  %v148_v6 = vpack.c.bf16 %v116_v55, %v116_v55 }
  0xb3   :  { %v479_v34 = vadd.f32 %v478_v23, %v340_v19  ;;  %v2527_v20 = vunpack.c.l.b16 %v149_v9 }
  0xb4   :  { %v2070_v27 = vpop.eup %2069  ;;  %v2005_v28 = vmul.f32 -1.442695, %v2476_v22  ;;  %v859_v29 = vadd.f32 %v2068_v7, %v858_v24  ;;  %v209_v16 = vunpack.c.l.b16 %v148_v6 }
  0xb5   :  { %v2072_v31 = vpop.eup %2071  ;;  %v2482_v32 = vadd.f32 1.0, %v2070_v27 }
  0xb6   :  { %2073 = vpow2.f32 %v2005_v28  ;;  %v863_v35 = vsel %vm862_vm9, %v2068_v7, %v859_v29  ;;  %v871_v36 = vmul.f32 %v2072_v31, %v2466_v8  ;;  %vm876_vm11 = vweird.f32 %v2072_v31 }
  0xb7   :  { %2075 = vrcp.f32 %v2482_v32  ;;  %v576_v37 = vpop.f32.mrf.mxu2  ;;  %v868_v38 = vsel %vm865_vm10, %v867_v33, %v863_v35  ;;  %vm877_vm13 = vmor %vm875_vm12, %vm876_vm11  ;;  %v896_v12 = vand.u32 2147483648, %v2482_v32  ;;  %vm890_vm3 = vweird.f32 %v2482_v32 }
  0xb8   :  { %v649_v41 = vadd.f32 %v576_v37, %v479_v34  ;;  %1354 = vrot.lane.b32.xlu0 %v868_v38, %s2188_s2  ;;  %v872_v45 = vsub.f32 1.0, %v871_v36  ;;  %v262_v34 = vpack.c.b16 %v209_v16, %v2480_v30  ;;  %v2539_v35 = vpack.c.b16 %v2527_v20, %v209_v16  ;;  %v86_v37 = vld [vmem:[%s3552_s1 + $0xd8] sm:$0xff]  ;;  %v55_v38 = vld [vmem:[%s3551_s0 + $0xe0] sm:$0xff] }
  0xb9   :  { %v343_v49 = vpop.f32.mrf.mxu0  ;;  %v897_v24 = vor.u32 1.1754944e-38, %v896_v12 }
  0xba   :  { %v2505_v44 = vadd.f32 %v2403_v5, %v649_v41  ;;  %v481_v51 = vpop.f32.mrf.mxu1  ;;  %v873_v52 = vmul.f32 %v2072_v31, %v872_v45 }
  0xbb   :  { %v482_v59 = vadd.f32 %v481_v51, %v343_v49  ;;  %v119_v49 = vadd.f32 %v87_v40, %v55_v38 }
  0xbc   :  { %v2074_v57 = vpop.eup %2073  ;;  %v2006_v58 = vmul.f32 -1.442695, %v2505_v44  ;;  %1963 = vmatmul.msk.bf16.gmra.mxu0 %vm266_vm2, %v261_v42  ;;  %1996 = vmatmul.msk.bf16.gmra.mxu2 %vm266_vm2, %v2492_v43  ;;  %v874_v61 = vadd.f32 %v2072_v31, %v873_v52 }
  0xbd   :  { %v2076_v62 = vpop.eup %2075  ;;  %v2513_v63 = vadd.f32 1.0, %v2074_v57  ;;  %1979 = vmatmul.msk.bf16.gmra.mxu1 %vm266_vm2, %v2448_v53  ;;  %v894_v53 = vand.u32 2147483647, %v2482_v32 }
  0xbe   :  { %2077 = vpow2.f32 %v2006_v58  ;;  %v878_v1 = vsel %vm877_vm13, %v2072_v31, %v874_v61  ;;  %v886_v2 = vmul.f32 %v2076_v62, %v2482_v32  ;;  %vm891_vm15 = vweird.f32 %v2076_v62  ;;  %v54_v32 = vld [vmem:[%s3551_s0 + $0xd8] sm:$0xff] }
  0xbf   :  { %2079 = vrcp.f32 %v2513_v63  ;;  %v579_v3 = vpop.f32.mrf.mxu2  ;;  %v883_v4 = vsel %vm880_vm14, %v882_v0, %v878_v1  ;;  %vm892_vm4 = vmor %vm890_vm3, %vm891_vm15  ;;  %vm895_vm5 = vcmp.eq.f32.partialorder %v894_v53, 8.507059e+37  ;;  %v911_v42 = vand.u32 2147483648, %v2513_v63 }
  0xc0   :  { %v650_v7 = vadd.f32 %v579_v3, %v482_v59  ;;  %1356 = vrot.lane.b32.xlu1 %v883_v4, %s2188_s2  ;;  %v887_v8 = vsub.f32 1.0, %v886_v2  ;;  %v909_v47 = vand.u32 2147483647, %v2513_v63  ;;  %v118_v48 = vadd.f32 %v86_v37, %v54_v32  ;;  %v88_v32 = vld [vmem:[%s3552_s1 + $0xe8] sm:$0xff] }
  0xc1   :  { %v345_v10 = vpop.f32.mrf.mxu0  ;;  %vm905_vm7 = vweird.f32 %v2513_v63  ;;  %v912_v57 = vor.u32 1.1754944e-38, %v911_v42  ;;  %v151_v2 = vpack.c.bf16 %v119_v49, %v119_v49 }
  0xc2   :  { %v2523_v13 = vadd.f32 %v2403_v5, %v650_v7  ;;  %v483_v14 = vpop.f32.mrf.mxu1  ;;  %v888_v15 = vmul.f32 %v2076_v62, %v887_v8  ;;  %vm910_vm9 = vcmp.eq.f32.partialorder %v909_v47, 8.507059e+37  ;;  %v150_v0 = vpack.c.bf16 %v118_v48, %v118_v48 }
  0xc3   :  { %v484_v25 = vadd.f32 %v483_v14, %v345_v10  ;;  %v2574_v14 = vunpack.c.l.b16 %v151_v2 }
  0xc4   :  { %v2078_v17 = vpop.eup %2077  ;;  %v2007_v18 = vmul.f32 -1.442695, %v2523_v13  ;;  %v889_v19 = vadd.f32 %v2076_v62, %v888_v15  ;;  %v211_v9 = vunpack.c.l.b16 %v150_v0 }
  0xc5   :  { %v2080_v21 = vpop.eup %2079  ;;  %v2529_v23 = vadd.f32 1.0, %v2078_v17 }
  0xc6   :  { %2081 = vpow2.f32 %v2007_v18  ;;  %v893_v27 = vsel %vm892_vm4, %v2076_v62, %v889_v19  ;;  %v901_v28 = vmul.f32 %v2080_v21, %v2513_v63  ;;  %vm906_vm6 = vweird.f32 %v2080_v21 }
  0xc7   :  { %2083 = vrcp.f32 %v2529_v23  ;;  %v581_v29 = vpop.f32.mrf.mxu2  ;;  %v898_v31 = vsel %vm895_vm5, %v897_v24, %v893_v27  ;;  %vm907_vm8 = vmor %vm905_vm7, %vm906_vm6  ;;  %v926_v4 = vand.u32 2147483648, %v2529_v23  ;;  %vm920_vm11 = vweird.f32 %v2529_v23 }
  0xc8   :  { %v651_v33 = vadd.f32 %v581_v29, %v484_v25  ;;  %1358 = vrot.lane.b32.xlu1 %v898_v31, %s2188_s2  ;;  %v902_v36 = vsub.f32 1.0, %v901_v28  ;;  %v263_v28 = vpack.c.b16 %v211_v9, %v2527_v20  ;;  %v2586_v29 = vpack.c.b16 %v2574_v14, %v211_v9 }
  0xc9   :  { %v348_v41 = vpop.f32.mrf.mxu0  ;;  %v927_v17 = vor.u32 1.1754944e-38, %v926_v4 }
  0xca   :  { %v2552_v30 = vadd.f32 %v2403_v5, %v651_v33  ;;  %v486_v45 = vpop.f32.mrf.mxu1  ;;  %v903_v46 = vmul.f32 %v2080_v21, %v902_v36  ;;  %v57_v33 = vld [vmem:[%s3551_s0 + $0xf0] sm:$0xff] }
  0xcb   :  { %v487_v52 = vadd.f32 %v486_v45, %v348_v41 }
  0xcc   :  { %v2082_v50 = vpop.eup %2081  ;;  %v2008_v51 = vmul.f32 -1.442695, %v2552_v30  ;;  %1964 = vmatmul.msk.bf16.gmra.mxu0 %vm266_vm2, %v262_v34  ;;  %1997 = vmatmul.msk.bf16.gmra.mxu2 %vm266_vm2, %v2539_v35  ;;  %v904_v54 = vadd.f32 %v2080_v21, %v903_v46  ;;  %v89_v34 = vld [vmem:[%s3552_s1 + $0xf0] sm:$0xff] }
  0xcd   :  { %v2084_v55 = vpop.eup %2083  ;;  %v2560_v56 = vadd.f32 1.0, %v2082_v50  ;;  %1980 = vmatmul.msk.bf16.gmra.mxu1 %vm266_vm2, %v2492_v43  ;;  %v924_v43 = vand.u32 2147483647, %v2529_v23  ;;  %v121_v45 = vadd.f32 %v89_v34, %v57_v33 }
  0xce   :  { %2085 = vpow2.f32 %v2008_v51  ;;  %v908_v58 = vsel %vm907_vm8, %v2080_v21, %v904_v54  ;;  %v916_v59 = vmul.f32 %v2084_v55, %v2529_v23  ;;  %vm921_vm10 = vweird.f32 %v2084_v55  ;;  %v56_v23 = vld [vmem:[%s3551_s0 + $0xe8] sm:$0xff] }
  0xcf   :  { %2087 = vrcp.f32 %v2560_v56  ;;  %v584_v61 = vpop.f32.mrf.mxu2  ;;  %v913_v62 = vsel %vm910_vm9, %v912_v57, %v908_v58  ;;  %vm922_vm12 = vmor %vm920_vm11, %vm921_vm10  ;;  %vm925_vm13 = vcmp.eq.f32.partialorder %v924_v43, 8.507059e+37  ;;  %v941_v37 = vand.u32 2147483648, %v2560_v56 }
  0xd0   :  { %v652_v1 = vadd.f32 %v584_v61, %v487_v52  ;;  %1360 = vrot.lane.b32.xlu2 %v913_v62, %s2188_s2  ;;  %v917_v63 = vsub.f32 1.0, %v916_v59  ;;  %v939_v41 = vand.u32 2147483647, %v2560_v56  ;;  %v120_v42 = vadd.f32 %v88_v32, %v56_v23 }
  0xd1   :  { %v350_v3 = vpop.f32.mrf.mxu0  ;;  %vm935_vm15 = vweird.f32 %v2560_v56  ;;  %v942_v52 = vor.u32 1.1754944e-38, %v941_v37  ;;  %v153_v62 = vpack.c.bf16 %v121_v45, %v121_v45 }
  0xd2   :  { %v2570_v6 = vadd.f32 %v2403_v5, %v652_v1  ;;  %v488_v7 = vpop.f32.mrf.mxu1  ;;  %v918_v8 = vmul.f32 %v2084_v55, %v917_v63  ;;  %vm940_vm4 = vcmp.eq.f32.partialorder %v939_v41, 8.507059e+37  ;;  %v152_v59 = vpack.c.bf16 %v120_v42, %v120_v42 }
  0xd3   :  { %v489_v18 = vadd.f32 %v488_v7, %v350_v3  ;;  %v2621_v9 = vunpack.c.l.b16 %v153_v62 }
  0xd4   :  { %v2086_v10 = vpop.eup %2085  ;;  %v2009_v53 = vmul.f32 -1.442695, %v2570_v6  ;;  %v919_v12 = vadd.f32 %v2084_v55, %v918_v8  ;;  %v213_v43 = vunpack.c.l.b16 %v152_v59 }
  0xd5   :  { %v2088_v15 = vpop.eup %2087  ;;  %v2576_v16 = vadd.f32 1.0, %v2086_v10 }
  0xd6   :  { %2089 = vpow2.f32 %v2009_v53  ;;  %v923_v19 = vsel %vm922_vm12, %v2084_v55, %v919_v12  ;;  %v931_v21 = vmul.f32 %v2088_v15, %v2560_v56  ;;  %vm936_vm14 = vweird.f32 %v2088_v15 }
  0xd7   :  { %2091 = vrcp.f32 %v2576_v16  ;;  %v586_v24 = vpop.f32.mrf.mxu2  ;;  %v928_v25 = vsel %vm925_vm13, %v927_v17, %v923_v19  ;;  %vm937_vm3 = vmor %vm935_vm15, %vm936_vm14  ;;  %v956_v1 = vand.u32 2147483648, %v2576_v16  ;;  %vm950_vm6 = vweird.f32 %v2576_v16  ;;  %v58_v19 = vld [vmem:[%s3551_s0 + $0xf8] sm:$0xff]  ;;  %s2190_s0 = smov 8  }
  0xd8   :  { %v653_v27 = vadd.f32 %v586_v24, %v489_v18  ;;  %1362 = vrot.lane.b32.xlu2 %v928_v25, %s2188_s2  ;;  %v932_v31 = vsub.f32 1.0, %v931_v21  ;;  %v264_v23 = vpack.c.b16 %v213_v43, %v2574_v14 }
  0xd9   :  { %v353_v36 = vpop.f32.mrf.mxu0  ;;  %v957_v12 = vor.u32 1.1754944e-38, %v956_v1 }
  0xda   :  { %v2599_v20 = vadd.f32 %v2403_v5, %v653_v27  ;;  %v491_v38 = vpop.f32.mrf.mxu1  ;;  %v933_v40 = vmul.f32 %v2088_v15, %v932_v31  ;;  %v2636_v27 = vpack.c.b16 %v2621_v9, %v213_v43 }
  0xdb   :  { %v492_v48 = vadd.f32 %v491_v38, %v353_v36 }
  0xdc   :  { %v2090_v46 = vpop.eup %2089  ;;  %v2010_v47 = vmul.f32 -1.442695, %v2599_v20  ;;  %1965 = vmatmul.msk.bf16.gmra.mxu0 %vm266_vm2, %v263_v28  ;;  %1998 = vmatmul.msk.bf16.gmra.mxu2 %vm266_vm2, %v2586_v29  ;;  %v934_v49 = vadd.f32 %v2088_v15, %v933_v40 }
  0xdd   :  { %v2092_v50 = vpop.eup %2091  ;;  %v2607_v51 = vadd.f32 1.0, %v2090_v46  ;;  %1981 = vmatmul.msk.bf16.gmra.mxu1 %vm266_vm2, %v2539_v35  ;;  %v954_v35 = vand.u32 2147483647, %v2576_v16 }
  0xde   :  { %2093 = vpow2.f32 %v2010_v47  ;;  %v938_v54 = vsel %vm937_vm3, %v2088_v15, %v934_v49  ;;  %v946_v55 = vmul.f32 %v2092_v50, %v2576_v16  ;;  %vm951_vm5 = vweird.f32 %v2092_v50  ;;  %v90_v16 = vld [vmem:[%s3552_s1 + $0xf8] sm:$0xff] }
  0xdf   :  { %2095 = vrcp.f32 %v2607_v51  ;;  %v589_v57 = vpop.f32.mrf.mxu2  ;;  %v943_v58 = vsel %vm940_vm4, %v942_v52, %v938_v54  ;;  %vm952_vm7 = vmor %vm950_vm6, %vm951_vm5  ;;  %vm955_vm8 = vcmp.eq.f32.partialorder %v954_v35, 8.507059e+37  ;;  %v971_v32 = vand.u32 2147483648, %v2607_v51 }
  0xe0   :  { %v654_v61 = vadd.f32 %v589_v57, %v492_v48  ;;  %1364 = vrot.lane.b32.xlu0 %v943_v58, %s2188_s2  ;;  %v947_v56 = vsub.f32 1.0, %v946_v55  ;;  %v122_v33 = vadd.f32 %v90_v16, %v58_v19  ;;  %v969_v38 = vand.u32 2147483647, %v2607_v51 }
  0xe1   :  { %v355_v0 = vpop.f32.mrf.mxu0  ;;  %vm965_vm10 = vweird.f32 %v2607_v51  ;;  %v972_v47 = vor.u32 1.1754944e-38, %v971_v32 }
  0xe2   :  { %v2617_v63 = vadd.f32 %v2403_v5, %v654_v61  ;;  %v493_v2 = vpop.f32.mrf.mxu1  ;;  %v948_v3 = vmul.f32 %v2092_v50, %v947_v56  ;;  %v154_v48 = vpack.c.bf16 %v122_v33, %v122_v33  ;;  %vm970_vm12 = vcmp.eq.f32.partialorder %v969_v38, 8.507059e+37 }
  0xe3   :  { %v494_v15 = vadd.f32 %v493_v2, %v355_v0 }
  0xe4   :  { %v2094_v4 = vpop.eup %2093  ;;  %v2011_v7 = vmul.f32 -1.442695, %v2617_v63  ;;  %v949_v8 = vadd.f32 %v2092_v50, %v948_v3  ;;  %v240_v59 = vunpack.c.l.b16 %v154_v48 }
  0xe5   :  { %v2096_v10 = vpop.eup %2095  ;;  %v2623_v53 = vadd.f32 1.0, %v2094_v4 }
  0xe6   :  { %2097 = vpow2.f32 %v2011_v7  ;;  %v953_v17 = vsel %vm952_vm7, %v2092_v50, %v949_v8  ;;  %v961_v18 = vmul.f32 %v2096_v10, %v2607_v51  ;;  %vm966_vm9 = vweird.f32 %v2096_v10 }
  0xe7   :  { %2099 = vrcp.f32 %v2623_v53  ;;  %v591_v21 = vpop.f32.mrf.mxu2  ;;  %v958_v24 = vsel %vm955_vm8, %v957_v12, %v953_v17  ;;  %vm967_vm11 = vmor %vm965_vm10, %vm966_vm9  ;;  %v984_v58 = vand.u32 2147483647, %v2623_v53  ;;  %vm980_vm14 = vweird.f32 %v2623_v53 }
  0xe8   :  { %v655_v25 = vadd.f32 %v591_v21, %v494_v15  ;;  %1366 = vrot.lane.b32.xlu1 %v958_v24, %s2188_s2  ;;  %v962_v28 = vsub.f32 1.0, %v961_v18  ;;  %v242_v4 = vpack.c.b16 %v240_v59, %v240_v59  ;;  %v265_v18 = vpack.c.b16 %v240_v59, %v2621_v9 }
  0xe9   :  { %v358_v31 = vpop.f32.mrf.mxu0  ;;  %vm985_vm3 = vcmp.eq.f32.partialorder %v984_v58, 8.507059e+37 }
  0xea   :  { %v2640_v34 = vadd.f32 %v2403_v5, %v655_v25  ;;  %v496_v36 = vpop.f32.mrf.mxu1  ;;  %v963_v37 = vmul.f32 %v2096_v10, %v962_v28  ;;  %v246_v16 = vsel %vm231_vm1, %v242_v4, 0 }
  0xeb   :  { %v497_v14 = vadd.f32 %v496_v36, %v358_v31 }
  0xec   :  { %v2098_v40 = vpop.eup %2097  ;;  %v2012_v41 = vmul.f32 -1.442695, %v2640_v34  ;;  %1966 = vmatmul.msk.bf16.gmra.mxu0 %vm266_vm2, %v264_v23  ;;  %1999 = vmatmul.msk.bf16.gmra.mxu2 %vm266_vm2, %v2636_v27  ;;  %v964_v42 = vadd.f32 %v2096_v10, %v963_v37 }
  0xed   :  { %v2100_v45 = vpop.eup %2099  ;;  %v2648_v46 = vadd.f32 1.0, %v2098_v40  ;;  %1982 = vmatmul.msk.bf16.gmra.mxu1 %vm266_vm2, %v2586_v29  ;;  %v986_v29 = vand.u32 2147483648, %v2623_v53 }
  0xee   :  { %2101 = vpow2.f32 %v2012_v41  ;;  %v968_v49 = vsel %vm967_vm11, %v2096_v10, %v964_v42  ;;  %v976_v50 = vmul.f32 %v2100_v45, %v2623_v53  ;;  %vm981_vm13 = vweird.f32 %v2100_v45 }
  0xef   :  { %2103 = vrcp.f32 %v2648_v46  ;;  %v594_v52 = vpop.f32.mrf.mxu2  ;;  %v973_v54 = vsel %vm970_vm12, %v972_v47, %v968_v49  ;;  %vm982_vm15 = vmor %vm980_vm14, %vm981_vm13  ;;  %v987_v43 = vor.u32 1.1754944e-38, %v986_v29  ;;  %v1001_v21 = vand.u32 2147483648, %v2648_v46 }
  0xf0   :  { %v656_v55 = vadd.f32 %v594_v52, %v497_v14  ;;  %1368 = vrot.lane.b32.xlu2 %v973_v54, %s2188_s2  ;;  %v977_v51 = vsub.f32 1.0, %v976_v50  ;;  %v999_v28 = vand.u32 2147483647, %v2648_v46  ;;  %vm995_vm1 = vweird.f32 %v2648_v46 }
  0xf1   :  { %v360_v57 = vpop.f32.mrf.mxu0  ;;  %v1002_v38 = vor.u32 1.1754944e-38, %v1001_v21 }
  0xf2   :  { %v2658_v61 = vadd.f32 %v2403_v5, %v656_v55  ;;  %v498_v56 = vpop.f32.mrf.mxu1  ;;  %v978_v62 = vmul.f32 %v2100_v45, %v977_v51  ;;  %vm1000_vm6 = vcmp.eq.f32.partialorder %v999_v28, 8.507059e+37 }
  0xf3   :  { %v499_v7 = vadd.f32 %v498_v56, %v360_v57 }
  0xf4   :  { %v2102_v0 = vpop.eup %2101  ;;  %v2013_v35 = vmul.f32 -1.442695, %v2658_v61  ;;  %v979_v1 = vadd.f32 %v2100_v45, %v978_v62 }
  0xf5   :  { %v2104_v2 = vpop.eup %2103  ;;  %v819_v3 = vadd.f32 1.0, %v2102_v0 }
  0xf6   :  { %2105 = vpow2.f32 %v2013_v35  ;;  %v983_v8 = vsel %vm982_vm15, %v2100_v45, %v979_v1  ;;  %v991_v10 = vmul.f32 %v2104_v2, %v2648_v46  ;;  %vm996_vm4 = vweird.f32 %v2104_v2 }
  0xf7   :  { %2107 = vrcp.f32 %v819_v3  ;;  %v596_v12 = vpop.f32.mrf.mxu2  ;;  %v988_v15 = vsel %vm985_vm3, %v987_v43, %v983_v8  ;;  %vm997_vm5 = vmor %vm995_vm1, %vm996_vm4  ;;  %v1014_v48 = vand.u32 2147483647, %v819_v3  ;;  %v1016_v49 = vand.u32 2147483648, %v819_v3 }
  0xf8   :  { %v657_v17 = vadd.f32 %v596_v12, %v499_v7  ;;  %1370 = vrot.lane.b32.xlu0 %v988_v15, %s2188_s2  ;;  %v992_v53 = vsub.f32 1.0, %v991_v10  ;;  %vm1010_vm8 = vweird.f32 %v819_v3  ;;  %v1496_v12 = vld [vmem:[%s3554_s4] sm:$0x3] }
  0xf9   :  { %v363_v19 = vpop.f32.mrf.mxu0  ;;  %vm1015_vm10 = vcmp.eq.f32.partialorder %v1014_v48, 8.507059e+37  ;;  %v1017_v29 = vor.u32 1.1754944e-38, %v1016_v49 }
  0xfa   :  { %v2668_v24 = vadd.f32 %v2403_v5, %v657_v17  ;;  %v501_v25 = vpop.f32.mrf.mxu1  ;;  %v993_v23 = vmul.f32 %v2104_v2, %v992_v53 }
  0xfb   :  { %v502_v33 = vadd.f32 %v501_v25, %v363_v19  ;;  %v1546_v19 = vsel %vm315_vm0, %v1496_v12, 0 }
  0xfc   :  { %v2106_v31 = vpop.eup %2105  ;;  %v2014_v32 = vmul.f32 -1.442695, %v2668_v24  ;;  %1967 = vmatmul.msk.bf16.gmra.mxu0 %vm266_vm2, %v265_v18  ;;  %2000 = vmatmul.msk.bf16.gmra.mxu2 %vm266_vm2, %v246_v16  ;;  %v994_v9 = vadd.f32 %v2104_v2, %v993_v23 }
  0xfd   :  { %v2108_v36 = vpop.eup %2107  ;;  %v2675_v37 = vadd.f32 1.0, %v2106_v31  ;;  %1983 = vmatmul.msk.bf16.gmra.mxu1 %vm266_vm2, %v2636_v27  ;;  %1555 = vmatpush.bf16.msra.mxu3 %v1546_v19 }
  0xfe   :  { %2109 = vpow2.f32 %v2014_v32  ;;  %v998_v40 = vsel %vm997_vm5, %v2104_v2, %v994_v9  ;;  %v1006_v41 = vmul.f32 %v2108_v36, %v819_v3  ;;  %vm1011_vm7 = vweird.f32 %v2108_v36 }
  0xff   :  { %2111 = vrcp.f32 %v2675_v37  ;;  %v599_v14 = vpop.f32.mrf.mxu2  ;;  %v1003_v42 = vsel %vm1000_vm6, %v1002_v38, %v998_v40  ;;  %vm1012_vm9 = vmor %vm1010_vm8, %vm1011_vm7  ;;  %v1031_v3 = vand.u32 2147483648, %v2675_v37  ;;  %v1029_v10 = vand.u32 2147483647, %v2675_v37 }
 0x100   :  { %v658_v45 = vadd.f32 %v599_v14, %v502_v33  ;;  %1372 = vrot.lane.b32.xlu1 %v1003_v42, %s2188_s2  ;;  %v1007_v46 = vsub.f32 1.0, %v1006_v41  ;;  %vm1025_vm12 = vweird.f32 %v2675_v37 }
 0x101   :  { %v365_v47 = vpop.f32.mrf.mxu0  ;;  %v1032_v25 = vor.u32 1.1754944e-38, %v1031_v3  ;;  %vm1030_vm14 = vcmp.eq.f32.partialorder %v1029_v10, 8.507059e+37 }
 0x102   :  { %v2682_v50 = vadd.f32 %v2403_v5, %v658_v45  ;;  %v503_v27 = vpop.f32.mrf.mxu1  ;;  %v1008_v52 = vmul.f32 %v2108_v36, %v1007_v46 }
 0x103   :  { %v504_v59 = vadd.f32 %v503_v27, %v365_v47 }
 0x104   :  { %v2110_v54 = vpop.eup %2109  ;;  %v2015_v55 = vmul.f32 -1.442695, %v2682_v50  ;;  %v1009_v51 = vadd.f32 %v2108_v36, %v1008_v52 }
 0x105   :  { %v2112_v57 = vpop.eup %2111  ;;  %v821_v58 = vadd.f32 1.0, %v2110_v54 }
 0x106   :  { %2113 = vpow2.f32 %v2015_v55  ;;  %v1013_v56 = vsel %vm1012_vm9, %v2108_v36, %v1009_v51  ;;  %v1021_v62 = vmul.f32 %v2112_v57, %v2675_v37  ;;  %vm1026_vm11 = vweird.f32 %v2112_v57 }
 0x107   :  { %2115 = vrcp.f32 %v821_v58  ;;  %v601_v0 = vpop.f32.mrf.mxu2  ;;  %v1018_v35 = vsel %vm1015_vm10, %v1017_v29, %v1013_v56  ;;  %vm1027_vm13 = vmor %vm1025_vm12, %vm1026_vm11  ;;  %v1044_v37 = vand.u32 2147483647, %v821_v58  ;;  %v1046_v38 = vand.u32 2147483648, %v821_v58 }
 0x108   :  { %v659_v1 = vadd.f32 %v601_v0, %v504_v59  ;;  %1374 = vrot.lane.b32.xlu2 %v1018_v35, %s2188_s2  ;;  %v1022_v2 = vsub.f32 1.0, %v1021_v62  ;;  %vm1040_vm15 = vweird.f32 %v821_v58 }
 0x109   :  { %v368_v43 = vpop.f32.mrf.mxu0  ;;  %vm1045_vm4 = vcmp.eq.f32.partialorder %v1044_v37, 8.507059e+37  ;;  %v1047_v49 = vor.u32 1.1754944e-38, %v1046_v38 }
 0x10a   :  { %v2689_v4 = vadd.f32 %v2403_v5, %v659_v1  ;;  %v506_v7 = vpop.f32.mrf.mxu1  ;;  %v1023_v8 = vmul.f32 %v2112_v57, %v1022_v2 }
 0x10b   :  { %v507_v18 = vadd.f32 %v506_v7, %v368_v43 }
 0x10c   :  { %v2114_v15 = vpop.eup %2113  ;;  %v2016_v17 = vmul.f32 -1.442695, %v2689_v4  ;;  %v1024_v53 = vadd.f32 %v2112_v57, %v1023_v8 }
 0x10d   :  { %v2116_v16 = vpop.eup %2115  ;;  %v822_v21 = vadd.f32 1.0, %v2114_v15 }
 0x10e   :  { %2117 = vpow2.f32 %v2016_v17  ;;  %v1028_v23 = vsel %vm1027_vm13, %v2112_v57, %v1024_v53  ;;  %v1036_v28 = vmul.f32 %v2116_v16, %v821_v58  ;;  %vm1041_vm0 = vweird.f32 %v2116_v16 }
 0x10f   :  { %2119 = vrcp.f32 %v822_v21  ;;  %v604_v31 = vpop.f32.mrf.mxu2  ;;  %v1033_v32 = vsel %vm1030_vm14, %v1032_v25, %v1028_v23  ;;  %vm1042_vm3 = vmor %vm1040_vm15, %vm1041_vm0  ;;  %v1061_v56 = vand.u32 2147483648, %v822_v21  ;;  %v1059_v35 = vand.u32 2147483647, %v822_v21 }
 0x110   :  { %v660_v33 = vadd.f32 %v604_v31, %v507_v18  ;;  %1376 = vrot.lane.b32.xlu0 %v1033_v32, %s2188_s2  ;;  %v1037_v9 = vsub.f32 1.0, %v1036_v28  ;;  %vm1055_vm5 = vweird.f32 %v822_v21 }
 0x111   :  { %v370_v36 = vpop.f32.mrf.mxu0  ;;  %v1062_v10 = vor.u32 1.1754944e-38, %v1061_v56  ;;  %vm1060_vm7 = vcmp.eq.f32.partialorder %v1059_v35, 8.507059e+37 }
 0x112   :  { %v2700_v40 = vadd.f32 %v2403_v5, %v660_v33  ;;  %v508_v41 = vpop.f32.mrf.mxu1  ;;  %v1038_v14 = vmul.f32 %v2116_v16, %v1037_v9 }
 0x113   :  { %v509_v27 = vadd.f32 %v508_v41, %v370_v36 }
 0x114   :  { %v2118_v42 = vpop.eup %2117  ;;  %v2017_v45 = vmul.f32 -1.442695, %v2700_v40  ;;  %v1039_v46 = vadd.f32 %v2116_v16, %v1038_v14 }
 0x115   :  { %v2120_v47 = vpop.eup %2119  ;;  %v823_v48 = vadd.f32 1.0, %v2118_v42 }
 0x116   :  { %2121 = vpow2.f32 %v2017_v45  ;;  %v1043_v52 = vsel %vm1042_vm3, %v2116_v16, %v1039_v46  ;;  %v1051_v54 = vmul.f32 %v2120_v47, %v822_v21  ;;  %vm1056_vm1 = vweird.f32 %v2120_v47  ;;  %v2712_v21 = vld [vmem:[%s3553_s3] ss:$0 sm:$0xff] }
 0x117   :  { %2123 = vrcp.f32 %v823_v48  ;;  %v606_v55 = vpop.f32.mrf.mxu2  ;;  %v1048_v51 = vsel %vm1045_vm4, %v1047_v49, %v1043_v52  ;;  %vm1057_vm6 = vmor %vm1055_vm5, %vm1056_vm1  ;;  %v1074_v16 = vand.u32 2147483647, %v823_v48  ;;  %v1076_v25 = vand.u32 2147483648, %v823_v48 }
 0x118   :  { %v661_v57 = vadd.f32 %v606_v55, %v509_v27  ;;  %1378 = vrot.lane.b32.xlu1 %v1048_v51, %s2188_s2  ;;  %v1052_v29 = vsub.f32 1.0, %v1051_v54  ;;  %vm1070_vm9 = vweird.f32 %v823_v48 }
 0x119   :  { %v373_v59 = vpop.f32.mrf.mxu0  ;;  %vm1075_vm11 = vcmp.eq.f32.partialorder %v1074_v16, 8.507059e+37  ;;  %v1077_v41 = vor.u32 1.1754944e-38, %v1076_v25 }
 0x11a   :  { %v2705_v58 = vadd.f32 %v2403_v5, %v661_v57  ;;  %v511_v62 = vpop.f32.mrf.mxu1  ;;  %v1053_v0 = vmul.f32 %v2120_v47, %v1052_v29 }
 0x11b   :  { %v512_v43 = vadd.f32 %v511_v62, %v373_v59 }
 0x11c   :  { %v2122_v1 = vpop.eup %2121  ;;  %v2018_v2 = vmul.f32 -1.442695, %v2705_v58  ;;  %v1054_v3 = vadd.f32 %v2120_v47, %v1053_v0 }
 0x11d   :  { %v2124_v7 = vpop.eup %2123  ;;  %v824_v8 = vadd.f32 1.0, %v2122_v1 }
 0x11e   :  { %2125 = vpow2.f32 %v2018_v2  ;;  %v1058_v12 = vsel %vm1057_vm6, %v2120_v47, %v1054_v3  ;;  %v1066_v15 = vmul.f32 %v2124_v7, %v823_v48  ;;  %vm1071_vm8 = vweird.f32 %v2124_v7 }
 0x11f   :  { %2127 = vrcp.f32 %v824_v8  ;;  %v609_v5 = vpop.f32.mrf.mxu2  ;;  %v1063_v17 = vsel %vm1060_vm7, %v1062_v10, %v1058_v12  ;;  %vm1072_vm10 = vmor %vm1070_vm9, %vm1071_vm8  ;;  %v1089_v54 = vand.u32 2147483647, %v824_v8  ;;  %v1091_v55 = vand.u32 2147483648, %v824_v8 }
 0x120   :  { %v662_v18 = vadd.f32 %v609_v5, %v512_v43  ;;  %1380 = vrot.lane.b32.xlu2 %v1063_v17, %s2188_s2  ;;  %v1067_v53 = vsub.f32 1.0, %v1066_v15  ;;  %vm1085_vm13 = vweird.f32 %v824_v8 }
 0x121   :  { %v375_v19 = vpop.f32.mrf.mxu0  ;;  %vm1090_vm0 = vcmp.eq.f32.partialorder %v1089_v54, 8.507059e+37  ;;  %v1092_v3 = vor.u32 1.1754944e-38, %v1091_v55 }
 0x122   :  { %v2715_v23 = vadd.f32 %v2712_v21, %v662_v18  ;;  %v513_v28 = vpop.f32.mrf.mxu1  ;;  %v1353_v31 = vpop.permute.xlu0 %1352  ;;  %v1068_v32 = vmul.f32 %v2124_v7, %v1067_v53 }
 0x123   :  { %v514_v14 = vadd.f32 %v513_v28, %v375_v19  ;;  %v1448_v29 = vmul.f32 %v1353_v31, %v2406_v11 }
 0x124   :  { %v2126_v33 = vpop.eup %2125  ;;  %v2019_v9 = vmul.f32 -1.442695, %v2715_v23  ;;  %v1069_v36 = vadd.f32 %v2124_v7, %v1068_v32 }
 0x125   :  { %v2128_v37 = vpop.eup %2127  ;;  %v825_v38 = vadd.f32 1.0, %v2126_v33 }
 0x126   :  { %2129 = vpow2.f32 %v2019_v9  ;;  %v1073_v42 = vsel %vm1072_vm10, %v2124_v7, %v1069_v36  ;;  %v1081_v45 = vmul.f32 %v2128_v37, %v824_v8  ;;  %vm1086_vm12 = vweird.f32 %v2128_v37 }
 0x127   :  { %2131 = vrcp.f32 %v825_v38  ;;  %v611_v46 = vpop.f32.mrf.mxu2  ;;  %v1078_v47 = vsel %vm1075_vm11, %v1077_v41, %v1073_v42  ;;  %vm1087_vm14 = vmor %vm1085_vm13, %vm1086_vm12  ;;  %v1104_v17 = vand.u32 2147483647, %v825_v38  ;;  %v1106_v18 = vand.u32 2147483648, %v825_v38 }
 0x128   :  { %v663_v49 = vadd.f32 %v611_v46, %v514_v14  ;;  %1382 = vrot.lane.b32.xlu0 %v1078_v47, %s2188_s2  ;;  %v1082_v27 = vsub.f32 1.0, %v1081_v45  ;;  %vm1100_vm3 = vweird.f32 %v825_v38 }
 0x129   :  { %v378_v52 = vpop.f32.mrf.mxu0  ;;  %vm1105_vm1 = vcmp.eq.f32.partialorder %v1104_v17, 8.507059e+37  ;;  %v1107_v36 = vor.u32 1.1754944e-38, %v1106_v18 }
 0x12a   :  { %v2720_v48 = vadd.f32 %v2712_v21, %v663_v49  ;;  %v516_v51 = vpop.f32.mrf.mxu1  ;;  %v1083_v57 = vmul.f32 %v2128_v37, %v1082_v27  ;;  %v1355_v59 = vpop.permute.xlu0 %1354 }
 0x12b   :  { %v517_v0 = vadd.f32 %v516_v51, %v378_v52  ;;  %v1449_v35 = vmul.f32 %v1355_v59, %v2427_v26  ;;  %v1361_v59 = vpop.permute.xlu2 %1360 }
 0x12c   :  { %v2130_v56 = vpop.eup %2129  ;;  %v2020_v62 = vmul.f32 -1.442695, %v2720_v48  ;;  %v1084_v1 = vadd.f32 %v2128_v37, %v1083_v57 }
 0x12d   :  { %v2132_v2 = vpop.eup %2131  ;;  %v826_v43 = vadd.f32 1.0, %v2130_v56  ;;  %v1480_v7 = vpack.c.bf16 %v1449_v35, %v1448_v29 }
 0x12e   :  { %2133 = vpow2.f32 %v2020_v62  ;;  %v1088_v10 = vsel %vm1087_vm14, %v2128_v37, %v1084_v1  ;;  %v1096_v12 = vmul.f32 %v2132_v2, %v825_v38  ;;  %vm1101_vm15 = vweird.f32 %v2132_v2 }
 0x12f   :  { %2135 = vrcp.f32 %v826_v43  ;;  %v614_v11 = vpop.f32.mrf.mxu2  ;;  %v1093_v15 = vsel %vm1090_vm0, %v1092_v3, %v1088_v10  ;;  %2033 = vmatmul.msk.bf16.vlgmr.msra.gmra.mxu3 %vm266_vm2, %v1480_v7  ;;  %vm1102_vm4 = vmor %vm1100_vm3, %vm1101_vm15  ;;  %v1119_v27 = vand.u32 2147483647, %v826_v43  ;;  %v1121_v52 = vand.u32 2147483648, %v826_v43 }
 0x130   :  { %v664_v8 = vadd.f32 %v614_v11, %v517_v0  ;;  %1384 = vrot.lane.b32.xlu1 %v1093_v15, %s2188_s2  ;;  %v1097_v5 = vsub.f32 1.0, %v1096_v12  ;;  %vm1115_vm6 = vweird.f32 %v826_v43 }
 0x131   :  { %v380_v26 = vpop.f32.mrf.mxu0  ;;  %vm1120_vm8 = vcmp.eq.f32.partialorder %v1119_v27, 8.507059e+37  ;;  %v1122_v3 = vor.u32 1.1754944e-38, %v1121_v52 }
 0x132   :  { %v2728_v53 = vadd.f32 %v2712_v21, %v664_v8  ;;  %v518_v19 = vpop.f32.mrf.mxu1  ;;  %v1098_v16 = vmul.f32 %v2132_v2, %v1097_v5  ;;  %v1357_v25 = vpop.permute.xlu1 %1356 }
 0x133   :  { %v519_v37 = vadd.f32 %v518_v19, %v380_v26  ;;  %v1450_v51 = vmul.f32 %v1357_v25, %v2435_v39 }
 0x134   :  { %v2134_v28 = vpop.eup %2133  ;;  %v2021_v31 = vmul.f32 -1.442695, %v2728_v53  ;;  %v1099_v32 = vadd.f32 %v2132_v2, %v1098_v16 }
 0x135   :  { %v2136_v33 = vpop.eup %2135  ;;  %v827_v9 = vadd.f32 1.0, %v2134_v28 }
 0x136   :  { %2137 = vpow2.f32 %v2021_v31  ;;  %v1103_v41 = vsel %vm1102_vm4, %v2132_v2, %v1099_v32  ;;  %v1111_v14 = vmul.f32 %v2136_v33, %v826_v43  ;;  %vm1116_vm5 = vweird.f32 %v2136_v33 }
 0x137   :  { %2139 = vrcp.f32 %v827_v9  ;;  %v616_v42 = vpop.f32.mrf.mxu2  ;;  %v1108_v45 = vsel %vm1105_vm1, %v1107_v36, %v1103_v41  ;;  %vm1117_vm7 = vmor %vm1115_vm6, %vm1116_vm5  ;;  %v1134_v8 = vand.u32 2147483647, %v827_v9  ;;  %v1136_v5 = vand.u32 2147483648, %v827_v9 }
 0x138   :  { %v665_v46 = vadd.f32 %v616_v42, %v519_v37  ;;  %1386 = vrot.lane.b32.xlu2 %v1108_v45, %s2188_s2  ;;  %v1112_v47 = vsub.f32 1.0, %v1111_v14  ;;  %vm1130_vm10 = vweird.f32 %v827_v9 }
 0x139   :  { %v383_v49 = vpop.f32.mrf.mxu0  ;;  %vm1135_vm12 = vcmp.eq.f32.partialorder %v1134_v8, 8.507059e+37  ;;  %v1137_v32 = vor.u32 1.1754944e-38, %v1136_v5 }
 0x13a   :  { %v2733_v38 = vadd.f32 %v2712_v21, %v665_v46  ;;  %v521_v54 = vpop.f32.mrf.mxu1  ;;  %v1113_v55 = vmul.f32 %v2136_v33, %v1112_v47  ;;  %v1359_v57 = vpop.permute.xlu1 %1358 }
 0x13b   :  { %v522_v62 = vadd.f32 %v521_v54, %v383_v49  ;;  %v1451_v0 = vmul.f32 %v1359_v57, %v2460_v60 }
 0x13c   :  { %v2138_v29 = vpop.eup %2137  ;;  %v2022_v56 = vmul.f32 -1.442695, %v2733_v38  ;;  %v1114_v35 = vadd.f32 %v2136_v33, %v1113_v55 }
 0x13d   :  { %v2140_v1 = vpop.eup %2139  ;;  %v2738_v2 = vadd.f32 1.0, %v2138_v29  ;;  %v1481_v7 = vpack.c.bf16 %v1451_v0, %v1450_v51  ;;  %v1452_v51 = vmul.f32 %v1361_v59, %v2476_v22 }
 0x13e   :  { %2141 = vpow2.f32 %v2022_v56  ;;  %v1118_v10 = vsel %vm1117_vm7, %v2136_v33, %v1114_v35  ;;  %v1126_v39 = vmul.f32 %v2140_v1, %v827_v9  ;;  %vm1131_vm9 = vweird.f32 %v2140_v1  ;;  %v1363_v33 = vpop.permute.xlu2 %1362 }
 0x13f   :  { %2143 = vrcp.f32 %v2738_v2  ;;  %v619_v43 = vpop.f32.mrf.mxu2  ;;  %v1123_v12 = vsel %vm1120_vm8, %v1122_v3, %v1118_v10  ;;  %2034 = vmatmul.msk.bf16.gmra.mxu3 %vm266_vm2, %v1481_v7  ;;  %vm1132_vm11 = vmor %vm1130_vm10, %vm1131_vm9  ;;  %v1453_v9 = vmul.f32 %v1363_v33, %v2505_v44  ;;  %v1151_v49 = vand.u32 2147483648, %v2738_v2 }
 0x140   :  { %v666_v11 = vadd.f32 %v619_v43, %v522_v62  ;;  %1388 = vrot.lane.b32.xlu0 %v1123_v12, %s2188_s2  ;;  %v1127_v60 = vsub.f32 1.0, %v1126_v39  ;;  %v1149_v55 = vand.u32 2147483647, %v2738_v2  ;;  %vm1145_vm14 = vweird.f32 %v2738_v2 }
 0x141   :  { %v385_v15 = vpop.f32.mrf.mxu0  ;;  %v1482_v0 = vpack.c.bf16 %v1453_v9, %v1452_v51 }
 0x142   :  { %v2744_v26 = vadd.f32 %v2712_v21, %v666_v11  ;;  %v523_v17 = vpop.f32.mrf.mxu1  ;;  %v1128_v18 = vmul.f32 %v2140_v1, %v1127_v60  ;;  %vm1150_vm15 = vcmp.eq.f32.partialorder %v1149_v55, 8.507059e+37 }
 0x143   :  { %v524_v36 = vadd.f32 %v523_v17, %v385_v15 }
 0x144   :  { %v2142_v19 = vpop.eup %2141  ;;  %v2023_v16 = vmul.f32 -1.442695, %v2744_v26  ;;  %v1129_v25 = vadd.f32 %v2140_v1, %v1128_v18 }
 0x145   :  { %v2144_v28 = vpop.eup %2143  ;;  %v829_v31 = vadd.f32 1.0, %v2142_v19 }
 0x146   :  { %2145 = vpow2.f32 %v2023_v16  ;;  %v1133_v37 = vsel %vm1132_vm11, %v2140_v1, %v1129_v25  ;;  %v1141_v41 = vmul.f32 %v2144_v28, %v2738_v2  ;;  %vm1146_vm13 = vweird.f32 %v2144_v28 }
 0x147   :  { %2147 = vrcp.f32 %v829_v31  ;;  %v621_v14 = vpop.f32.mrf.mxu2  ;;  %v1138_v42 = vsel %vm1135_vm12, %v1137_v32, %v1133_v37  ;;  %vm1147_vm0 = vmor %vm1145_vm14, %vm1146_vm13  ;;  %v1152_v1 = vor.u32 1.1754944e-38, %v1151_v49  ;;  %v1164_v43 = vand.u32 2147483647, %v829_v31 }
 0x148   :  { %v667_v45 = vadd.f32 %v621_v14, %v524_v36  ;;  %1390 = vrot.lane.b32.xlu1 %v1138_v42, %s2188_s2  ;;  %v1142_v46 = vsub.f32 1.0, %v1141_v41  ;;  %v1166_v12 = vand.u32 2147483648, %v829_v31  ;;  %vm1160_vm4 = vweird.f32 %v829_v31 }
 0x149   :  { %v388_v47 = vpop.f32.mrf.mxu0  ;;  %vm1165_vm5 = vcmp.eq.f32.partialorder %v1164_v43, 8.507059e+37 }
 0x14a   :  { %v2752_v27 = vadd.f32 %v2712_v21, %v667_v45  ;;  %v526_v52 = vpop.f32.mrf.mxu1  ;;  %v1143_v54 = vmul.f32 %v2144_v28, %v1142_v46  ;;  %v1167_v16 = vor.u32 1.1754944e-38, %v1166_v12 }
 0x14b   :  { %v527_v56 = vadd.f32 %v526_v52, %v388_v47 }
 0x14c   :  { %v2146_v57 = vpop.eup %2145  ;;  %v2024_v29 = vmul.f32 -1.442695, %v2752_v27  ;;  %v1144_v62 = vadd.f32 %v2144_v28, %v1143_v54 }
 0x14d   :  { %v2148_v44 = vpop.eup %2147  ;;  %v2758_v35 = vadd.f32 1.0, %v2146_v57 }
 0x14e   :  { %2149 = vpow2.f32 %v2024_v29  ;;  %v1148_v3 = vsel %vm1147_vm0, %v2144_v28, %v1144_v62  ;;  %v1156_v7 = vmul.f32 %v2148_v44, %v829_v31  ;;  %vm1161_vm3 = vweird.f32 %v2148_v44 }
 0x14f   :  { %2151 = vrcp.f32 %v2758_v35  ;;  %v624_v22 = vpop.f32.mrf.mxu2  ;;  %v1153_v59 = vsel %vm1150_vm15, %v1152_v1, %v1148_v3  ;;  %2035 = vmatmul.msk.bf16.gmra.mxu3 %vm266_vm2, %v1482_v0  ;;  %vm1162_vm1 = vmor %vm1160_vm4, %vm1161_vm3  ;;  %v1181_v31 = vand.u32 2147483648, %v2758_v35  ;;  %v1179_v49 = vand.u32 2147483647, %v2758_v35 }
 0x150   :  { %v668_v10 = vadd.f32 %v624_v22, %v527_v56  ;;  %1392 = vrot.lane.b32.xlu2 %v1153_v59, %s2188_s2  ;;  %v1157_v2 = vsub.f32 1.0, %v1156_v7  ;;  %vm1175_vm7 = vweird.f32 %v2758_v35 }
 0x151   :  { %v390_v39 = vpop.f32.mrf.mxu0  ;;  %v1182_v0 = vor.u32 1.1754944e-38, %v1181_v31  ;;  %vm1180_vm9 = vcmp.eq.f32.partialorder %v1179_v49, 8.507059e+37 }
 0x152   :  { %v2764_v11 = vadd.f32 %v2712_v21, %v668_v10  ;;  %v528_v60 = vpop.f32.mrf.mxu1  ;;  %v1158_v15 = vmul.f32 %v2148_v44, %v1157_v2  ;;  %v1365_v37 = vpop.permute.xlu0 %1364 }
 0x153   :  { %v529_v25 = vadd.f32 %v528_v60, %v390_v39  ;;  %v1454_v52 = vmul.f32 %v1365_v37, %v2523_v13 }
 0x154   :  { %v2150_v8 = vpop.eup %2149  ;;  %v2025_v5 = vmul.f32 -1.442695, %v2764_v11  ;;  %v1159_v17 = vadd.f32 %v2148_v44, %v1158_v15 }
 0x155   :  { %v2152_v18 = vpop.eup %2151  ;;  %v831_v19 = vadd.f32 1.0, %v2150_v8 }
 0x156   :  { %2153 = vpow2.f32 %v2025_v5  ;;  %v1163_v28 = vsel %vm1162_vm1, %v2148_v44, %v1159_v17  ;;  %v1171_v32 = vmul.f32 %v2152_v18, %v2758_v35  ;;  %vm1176_vm6 = vweird.f32 %v2152_v18 }
 0x157   :  { %2155 = vrcp.f32 %v831_v19  ;;  %v626_v33 = vpop.f32.mrf.mxu2  ;;  %v1168_v36 = vsel %vm1165_vm5, %v1167_v16, %v1163_v28  ;;  %vm1177_vm8 = vmor %vm1175_vm7, %vm1176_vm6  ;;  %v1194_v59 = vand.u32 2147483647, %v831_v19  ;;  %v1196_v10 = vand.u32 2147483648, %v831_v19 }
 0x158   :  { %v669_v41 = vadd.f32 %v626_v33, %v529_v25  ;;  %1394 = vrot.lane.b32.xlu0 %v1168_v36, %s2188_s2  ;;  %v1172_v14 = vsub.f32 1.0, %v1171_v32  ;;  %vm1190_vm11 = vweird.f32 %v831_v19  ;;  %v1369_v33 = vpop.permute.xlu2 %1368 }
 0x159   :  { %v393_v42 = vpop.f32.mrf.mxu0  ;;  %vm1195_vm13 = vcmp.eq.f32.partialorder %v1194_v59, 8.507059e+37  ;;  %v1197_v17 = vor.u32 1.1754944e-38, %v1196_v10 }
 0x15a   :  { %v2771_v45 = vadd.f32 %v2712_v21, %v669_v41  ;;  %v531_v46 = vpop.f32.mrf.mxu1  ;;  %v1367_v9 = vpop.permute.xlu1 %1366  ;;  %v1173_v47 = vmul.f32 %v2152_v18, %v1172_v14 }
 0x15b   :  { %v1455_v54 = vmul.f32 %v1367_v9, %v2552_v30  ;;  %v532_v57 = vadd.f32 %v531_v46, %v393_v42 }
 0x15c   :  { %v2154_v55 = vpop.eup %2153  ;;  %v2026_v51 = vmul.f32 -1.442695, %v2771_v45  ;;  %v1174_v29 = vadd.f32 %v2152_v18, %v1173_v47  ;;  %v1456_v47 = vmul.f32 %v1369_v33, %v2570_v6 }
 0x15d   :  { %v2156_v56 = vpop.eup %2155  ;;  %v2778_v62 = vadd.f32 1.0, %v2154_v55  ;;  %v1483_v44 = vpack.c.bf16 %v1455_v54, %v1454_v52 }
 0x15e   :  { %2157 = vpow2.f32 %v2026_v51  ;;  %v1178_v1 = vsel %vm1177_vm8, %v2152_v18, %v1174_v29  ;;  %v1186_v3 = vmul.f32 %v2156_v56, %v831_v19  ;;  %vm1191_vm10 = vweird.f32 %v2156_v56 }
 0x15f   :  { %2159 = vrcp.f32 %v2778_v62  ;;  %v629_v13 = vpop.f32.mrf.mxu2  ;;  %v1183_v30 = vsel %vm1180_vm9, %v1182_v0, %v1178_v1  ;;  %2036 = vmatmul.msk.bf16.gmra.mxu3 %vm266_vm2, %v1483_v44  ;;  %vm1192_vm12 = vmor %vm1190_vm11, %vm1191_vm10  ;;  %v1211_v19 = vand.u32 2147483648, %v2778_v62  ;;  %v1209_v9 = vand.u32 2147483647, %v2778_v62 }
 0x160   :  { %v670_v7 = vadd.f32 %v629_v13, %v532_v57  ;;  %1396 = vrot.lane.b32.xlu1 %v1183_v30, %s2188_s2  ;;  %v1187_v35 = vsub.f32 1.0, %v1186_v3  ;;  %vm1205_vm0 = vweird.f32 %v2778_v62 }
 0x161   :  { %v395_v22 = vpop.f32.mrf.mxu0  ;;  %v1212_v44 = vor.u32 1.1754944e-38, %v1211_v19  ;;  %vm1210_vm3 = vcmp.eq.f32.partialorder %v1209_v9, 8.507059e+37 }
 0x162   :  { %v2784_v2 = vadd.f32 %v2712_v21, %v670_v7  ;;  %v533_v39 = vpop.f32.mrf.mxu1  ;;  %v1188_v43 = vmul.f32 %v2156_v56, %v1187_v35 }
 0x163   :  { %v534_v18 = vadd.f32 %v533_v39, %v395_v22 }
 0x164   :  { %v2158_v12 = vpop.eup %2157  ;;  %v2027_v60 = vmul.f32 -1.442695, %v2784_v2  ;;  %v1189_v15 = vadd.f32 %v2156_v56, %v1188_v43 }
 0x165   :  { %v2160_v8 = vpop.eup %2159  ;;  %v833_v5 = vadd.f32 1.0, %v2158_v12 }
 0x166   :  { %2161 = vpow2.f32 %v2027_v60  ;;  %v1193_v16 = vsel %vm1192_vm12, %v2156_v56, %v1189_v15  ;;  %v1201_v25 = vmul.f32 %v2160_v8, %v2778_v62  ;;  %vm1206_vm14 = vweird.f32 %v2160_v8 }
 0x167   :  { %2163 = vrcp.f32 %v833_v5  ;;  %v631_v28 = vpop.f32.mrf.mxu2  ;;  %v1198_v32 = vsel %vm1195_vm13, %v1197_v17, %v1193_v16  ;;  %vm1207_vm15 = vmor %vm1205_vm0, %vm1206_vm14  ;;  %v1224_v62 = vand.u32 2147483647, %v833_v5  ;;  %v1226_v7 = vand.u32 2147483648, %v833_v5 }
 0x168   :  { %v671_v36 = vadd.f32 %v631_v28, %v534_v18  ;;  %1398 = vrot.lane.b32.xlu2 %v1198_v32, %s2188_s2  ;;  %v1202_v37 = vsub.f32 1.0, %v1201_v25  ;;  %vm1220_vm1 = vweird.f32 %v833_v5  ;;  %v1375_v32 = vpop.permute.xlu2 %1374 }
 0x169   :  { %v398_v41 = vpop.f32.mrf.mxu0  ;;  %vm1225_vm6 = vcmp.eq.f32.partialorder %v1224_v62, 8.507059e+37  ;;  %v1227_v15 = vor.u32 1.1754944e-38, %v1226_v7  ;;  %v1459_v9 = vmul.f32 %v1375_v32, %v2640_v34 }
 0x16a   :  { %v2791_v14 = vadd.f32 %v2712_v21, %v671_v36  ;;  %v536_v42 = vpop.f32.mrf.mxu1  ;;  %v1371_v31 = vpop.permute.xlu0 %1370  ;;  %v1203_v46 = vmul.f32 %v2160_v8, %v1202_v37 }
 0x16b   :  { %v1457_v49 = vmul.f32 %v1371_v31, %v2599_v20  ;;  %v537_v55 = vadd.f32 %v536_v42, %v398_v41 }
 0x16c   :  { %v2162_v52 = vpop.eup %2161  ;;  %v2028_v54 = vmul.f32 -1.442695, %v2791_v14  ;;  %v1204_v51 = vadd.f32 %v2160_v8, %v1203_v46 }
 0x16d   :  { %v2164_v57 = vpop.eup %2163  ;;  %v834_v29 = vadd.f32 1.0, %v2162_v52  ;;  %v1484_v56 = vpack.c.bf16 %v1457_v49, %v1456_v47 }
 0x16e   :  { %2165 = vpow2.f32 %v2028_v54  ;;  %v1208_v0 = vsel %vm1207_vm15, %v2160_v8, %v1204_v51  ;;  %v1216_v1 = vmul.f32 %v2164_v57, %v833_v5  ;;  %vm1221_vm4 = vweird.f32 %v2164_v57 }
 0x16f   :  { %2167 = vrcp.f32 %v834_v29  ;;  %v634_v6 = vpop.f32.mrf.mxu2  ;;  %v1213_v3 = vsel %vm1210_vm3, %v1212_v44, %v1208_v0  ;;  %2037 = vmatmul.msk.bf16.gmra.mxu3 %vm266_vm2, %v1484_v56  ;;  %vm1222_vm5 = vmor %vm1220_vm1, %vm1221_vm4  ;;  %v1239_v5 = vand.u32 2147483647, %v834_v29  ;;  %v1241_v41 = vand.u32 2147483648, %v834_v29 }
 0x170   :  { %v672_v20 = vadd.f32 %v634_v6, %v537_v55  ;;  %1400 = vrot.lane.b32.xlu0 %v1213_v3, %s2188_s2  ;;  %v1217_v13 = vsub.f32 1.0, %v1216_v1  ;;  %vm1235_vm8 = vweird.f32 %v834_v29 }
 0x171   :  { %v400_v30 = vpop.f32.mrf.mxu0  ;;  %vm1240_vm10 = vcmp.eq.f32.partialorder %v1239_v5, 8.507059e+37 }
 0x172   :  { %v2801_v35 = vadd.f32 %v2712_v21, %v672_v20  ;;  %v538_v22 = vpop.f32.mrf.mxu1  ;;  %v1218_v59 = vmul.f32 %v2164_v57, %v1217_v13  ;;  %v1373_v16 = vpop.permute.xlu1 %1372 }
 0x173   :  { %v539_v8 = vadd.f32 %v538_v22, %v400_v30  ;;  %v1458_v19 = vmul.f32 %v1373_v16, %v2617_v63 }
 0x174   :  { %v2166_v10 = vpop.eup %2165  ;;  %v2029_v39 = vmul.f32 -1.442695, %v2801_v35  ;;  %v1219_v43 = vadd.f32 %v2164_v57, %v1218_v59 }
 0x175   :  { %v2168_v12 = vpop.eup %2167  ;;  %v835_v60 = vadd.f32 1.0, %v2166_v10  ;;  %v1485_v63 = vpack.c.bf16 %v1459_v9, %v1458_v19 }
 0x176   :  { %2169 = vpow2.f32 %v2029_v39  ;;  %v1223_v17 = vsel %vm1222_vm5, %v2164_v57, %v1219_v43  ;;  %v1231_v18 = vmul.f32 %v2168_v12, %v834_v29  ;;  %vm1236_vm7 = vweird.f32 %v2168_v12 }
 0x177   :  { %2171 = vrcp.f32 %v835_v60  ;;  %v636_v25 = vpop.f32.mrf.mxu2  ;;  %v1228_v28 = vsel %vm1225_vm6, %v1227_v15, %v1223_v17  ;;  %vm1237_vm9 = vmor %vm1235_vm8, %vm1236_vm7  ;;  %v1242_v57 = vor.u32 1.1754944e-38, %v1241_v41  ;;  %v1254_v3 = vand.u32 2147483647, %v835_v60 }
 0x178   :  { %v673_v33 = vadd.f32 %v636_v25, %v539_v8  ;;  %1402 = vrot.lane.b32.xlu1 %v1228_v28, %s2188_s2  ;;  %v1232_v36 = vsub.f32 1.0, %v1231_v18  ;;  %v1256_v29 = vand.u32 2147483648, %v835_v60  ;;  %vm1250_vm12 = vweird.f32 %v835_v60 }
 0x179   :  { %v403_v37 = vpop.f32.mrf.mxu0  ;;  %vm1255_vm14 = vcmp.eq.f32.partialorder %v1254_v3, 8.507059e+37 }
 0x17a   :  { %v2807_v42 = vadd.f32 %v2712_v21, %v673_v33  ;;  %v541_v31 = vpop.f32.mrf.mxu1  ;;  %v1233_v46 = vmul.f32 %v2168_v12, %v1232_v36  ;;  %v1257_v43 = vor.u32 1.1754944e-38, %v1256_v29 }
 0x17b   :  { %v542_v52 = vadd.f32 %v541_v31, %v403_v37 }
 0x17c   :  { %v2170_v47 = vpop.eup %2169  ;;  %v2030_v49 = vmul.f32 -1.442695, %v2807_v42  ;;  %v1234_v54 = vadd.f32 %v2168_v12, %v1233_v46 }
 0x17d   :  { %v2172_v55 = vpop.eup %2171  ;;  %v836_v51 = vadd.f32 1.0, %v2170_v47 }
 0x17e   :  { %2173 = vpow2.f32 %v2030_v49  ;;  %v1238_v56 = vsel %vm1237_vm9, %v2168_v12, %v1234_v54  ;;  %v1246_v44 = vmul.f32 %v2172_v55, %v835_v60  ;;  %vm1251_vm11 = vweird.f32 %v2172_v55 }
 0x17f   :  { %2175 = vrcp.f32 %v836_v51  ;;  %v639_v0 = vpop.f32.mrf.mxu2  ;;  %v1243_v1 = vsel %vm1240_vm10, %v1242_v57, %v1238_v56  ;;  %2038 = vmatmul.msk.bf16.gmra.mxu3 %vm266_vm2, %v1485_v63  ;;  %vm1252_vm13 = vmor %vm1250_vm12, %vm1251_vm11  ;;  %v1271_v32 = vand.u32 2147483648, %v836_v51  ;;  %v1269_v37 = vand.u32 2147483647, %v836_v51  ;;  %v1637_v63 = vld [vmem:[%s3556_s6] sm:$0xff] }
 0x180   :  { %v674_v6 = vadd.f32 %v639_v0, %v542_v52  ;;  %1404 = vrot.lane.b32.xlu2 %v1243_v1, %s2188_s2  ;;  %v1247_v34 = vsub.f32 1.0, %v1246_v44  ;;  %vm1265_vm15 = vweird.f32 %v836_v51  ;;  %1681 = vst.msk [vmem:[%s3557_s7] sm:$0xff] %vm266_vm2, %v1637_v63 }
 0x181   :  { %v405_v30 = vpop.f32.mrf.mxu0  ;;  %v1272_v52 = vor.u32 1.1754944e-38, %v1271_v32  ;;  %vm1270_vm4 = vcmp.eq.f32.partialorder %v1269_v37, 8.507059e+37  ;;  %1725 = vst.msk [vmem:[%s3557_s7 + $0x160] sm:$0xff] %vm266_vm2, %v1637_v63 }
 0x182   :  { %v2814_v20 = vadd.f32 %v2712_v21, %v674_v6  ;;  %v1248_v13 = vmul.f32 %v2172_v55, %v1247_v34  ;;  %v543_v62 = vpop.f32.mrf.mxu1  ;;  %v1377_v16 = vpop.permute.xlu0 %1376 }
 0x183   :  { %v544_v12 = vadd.f32 %v543_v62, %v405_v30  ;;  %v1460_v5 = vmul.f32 %v1377_v16, %v2658_v61 }
 0x184   :  { %v2174_v7 = vpop.eup %2173  ;;  %v2031_v22 = vmul.f32 -1.442695, %v2814_v20  ;;  %v1249_v59 = vadd.f32 %v2172_v55, %v1248_v13  ;;  %v1381_v13 = vpop.permute.xlu2 %1380 }
 0x185   :  { %v2176_v10 = vpop.eup %2175  ;;  %v837_v39 = vadd.f32 1.0, %v2174_v7 }
 0x186   :  { %2177 = vpow2.f32 %v2031_v22  ;;  %v1253_v15 = vsel %vm1252_vm13, %v2172_v55, %v1249_v59  ;;  %v1261_v8 = vmul.f32 %v2176_v10, %v836_v51  ;;  %vm1266_vm0 = vweird.f32 %v2176_v10 }
 0x187   :  { %2179 = vrcp.f32 %v837_v39  ;;  %v641_v17 = vpop.f32.mrf.mxu2  ;;  %v1258_v18 = vsel %vm1255_vm14, %v1257_v43, %v1253_v15  ;;  %vm1267_vm3 = vmor %vm1265_vm15, %vm1266_vm0  ;;  %v1284_v51 = vand.u32 2147483647, %v837_v39  ;;  %vm1280_vm5 = vweird.f32 %v837_v39  ;;  %v2057_v43 = vld [vmem:[%s3555_s5 + $0x1] ss:$0 sm:$0xff]  ;;  %v1638_v15 = vld [vmem:[%s3556_s6 + $0x8] sm:$0xff] }
 0x188   :  { %v675_v25 = vadd.f32 %v641_v17, %v544_v12  ;;  %1406 = vrot.lane.b32.xlu0 %v1258_v18, %s2188_s2  ;;  %v1262_v28 = vsub.f32 1.0, %v1261_v8  ;;  %1682 = vst.msk [vmem:[%s3557_s7 + $0x8] sm:$0xff] %vm266_vm2, %v1638_v15 }
 0x189   :  { %vm1285_vm7 = vcmp.eq.f32.partialorder %v1284_v51, 8.507059e+37  ;;  %1726 = vst.msk [vmem:[%s3557_s7 + $0x168] sm:$0xff] %vm266_vm2, %v1638_v15 }
 0x18a   :  { %v2819_v60 = vadd.f32 %v2712_v21, %v675_v25  ;;  %v1379_v33 = vpop.permute.xlu1 %1378  ;;  %v1263_v36 = vmul.f32 %v2176_v10, %v1262_v28 }
 0x18b   :  { %v1461_v41 = vmul.f32 %v1379_v33, %v2668_v24  ;;  %v1286_v24 = vand.u32 2147483648, %v837_v39 }
 0x18c   :  { %v2178_v19 = vpop.eup %2177  ;;  %v2032_v31 = vmul.f32 -1.442695, %v2819_v60  ;;  %v1264_v46 = vadd.f32 %v2176_v10, %v1263_v36  ;;  %v1639_v36 = vld [vmem:[%s3556_s6 + $0x10] sm:$0xff] }
 0x18d   :  { %v2180_v9 = vpop.eup %2179  ;;  %v838_v47 = vadd.f32 1.0, %v2178_v19  ;;  %v1486_v49 = vpack.c.bf16 %v1461_v41, %v1460_v5  ;;  %v1287_v6 = vor.u32 1.1754944e-38, %v1286_v24  ;;  %1683 = vst.msk [vmem:[%s3557_s7 + $0x10] sm:$0xff] %vm266_vm2, %v1639_v36  ;;  %v2058_v41 = vld [vmem:[%s3555_s5 + $0x2] ss:$0 sm:$0xff] }
 0x18e   :  { %2181 = vpow2.f32 %v2032_v31  ;;  %v1268_v21 = vsel %vm1267_vm3, %v2176_v10, %v1264_v46  ;;  %v1276_v54 = vmul.f32 %v2180_v9, %v837_v39  ;;  %vm1281_vm1 = vweird.f32 %v2180_v9  ;;  %1727 = vst.msk [vmem:[%s3557_s7 + $0x170] sm:$0xff] %vm266_vm2, %v1639_v36 }
 0x18f   :  { %2183 = vrcp.f32 %v838_v47  ;;  %v1273_v55 = vsel %vm1270_vm4, %v1272_v52, %v1268_v21  ;;  %2039 = vmatmul.msk.bf16.gmra.mxu3 %vm266_vm2, %v1486_v49  ;;  %vm1282_vm6 = vmor %vm1280_vm5, %vm1281_vm1  ;;  %v1301_v62 = vand.u32 2147483648, %v838_v47  ;;  %v1299_v59 = vand.u32 2147483647, %v838_v47  ;;  %v1640_v49 = vld [vmem:[%s3556_s6 + $0x18] sm:$0xff] }
 0x190   :  { %1408 = vrot.lane.b32.xlu1 %v1273_v55, %s2188_s2  ;;  %v1277_v61 = vsub.f32 1.0, %v1276_v54  ;;  %v1462_v10 = vmul.f32 %v1381_v13, %v2682_v50  ;;  %vm1295_vm9 = vweird.f32 %v838_v47  ;;  %1684 = vst.msk [vmem:[%s3557_s7 + $0x18] sm:$0xff] %vm266_vm2, %v1640_v49 }
 0x191   :  { %v1302_v18 = vor.u32 1.1754944e-38, %v1301_v62  ;;  %vm1300_vm11 = vcmp.eq.f32.partialorder %v1299_v59, 8.507059e+37  ;;  %1728 = vst.msk [vmem:[%s3557_s7 + $0x178] sm:$0xff] %vm266_vm2, %v1640_v49 }
 0x192   :  { %v1278_v57 = vmul.f32 %v2180_v9, %v1277_v61 }
 0x194   :  { %v2182_v56 = vpop.eup %2181  ;;  %v1279_v44 = vadd.f32 %v2180_v9, %v1278_v57 }
 0x195   :  { %v2184_v0 = vpop.eup %2183  ;;  %v839_v1 = vadd.f32 1.0, %v2182_v56 }
 0x196   :  { %v1283_v34 = vsel %vm1282_vm6, %v2180_v9, %v1279_v44  ;;  %v1291_v3 = vmul.f32 %v2184_v0, %v838_v47  ;;  %vm1296_vm8 = vweird.f32 %v2184_v0  ;;  %v1387_v9 = vpop.permute.xlu2 %1386 }
 0x197   :  { %2185 = vrcp.f32 %v839_v1  ;;  %v1288_v29 = vsel %vm1285_vm7, %v1287_v6, %v1283_v34  ;;  %vm1297_vm10 = vmor %vm1295_vm9, %vm1296_vm8  ;;  %v1316_v28 = vand.u32 2147483648, %v839_v1  ;;  %v1314_v33 = vand.u32 2147483647, %v839_v1 }
 0x198   :  { %1410 = vrot.lane.b32.xlu2 %v1288_v29, %s2188_s2  ;;  %v1292_v30 = vsub.f32 1.0, %v1291_v3  ;;  %vm1310_vm13 = vweird.f32 %v839_v1  ;;  %v1465_v52 = vmul.f32 %v1387_v9, %v2705_v58 }
 0x199   :  { %v1317_v5 = vor.u32 1.1754944e-38, %v1316_v28  ;;  %vm1315_vm0 = vcmp.eq.f32.partialorder %v1314_v33, 8.507059e+37 }
 0x19a   :  { %v1383_v7 = vpop.permute.xlu0 %1382  ;;  %v1293_v22 = vmul.f32 %v2184_v0, %v1292_v30 }
 0x19b   :  { %v1463_v39 = vmul.f32 %v1383_v7, %v2689_v4 }
 0x19c   :  { %v1294_v12 = vadd.f32 %v2184_v0, %v1293_v22 }
 0x19d   :  { %v2186_v8 = vpop.eup %2185  ;;  %v1487_v17 = vpack.c.bf16 %v1463_v39, %v1462_v10 }
 0x19e   :  { %v1298_v50 = vsel %vm1297_vm10, %v2184_v0, %v1294_v12  ;;  %v1306_v4 = vmul.f32 %v2186_v8, %v839_v1  ;;  %vm1311_vm12 = vweird.f32 %v2186_v8 }
 0x19f   :  { %v1303_v16 = vsel %vm1300_vm11, %v1302_v18, %v1298_v50  ;;  %2040 = vmatmul.msk.bf16.gmra.mxu3 %vm266_vm2, %v1487_v17  ;;  %vm1312_vm14 = vmor %vm1310_vm13, %vm1311_vm12 }
 0x1a0   :  { %1793 = vrot.lane.b32.xlu2 %v2057_v43, %s2189_s9  ;;  %v1307_v25 = vsub.f32 1.0, %v1306_v4  ;;  %1412 = vrot.lane.b32.xlu0 %v1303_v16, %s2188_s2 }
 0x1a2   :  { %v1308_v32 = vmul.f32 %v2186_v8, %v1307_v25  ;;  %v1385_v31 = vpop.permute.xlu1 %1384 }
 0x1a3   :  { %v1464_v47 = vmul.f32 %v1385_v31, %v2700_v40  ;;  %v2887_v40 = vld [vmem:[%s3555_s5] ss:$0 sm:$0xff] }
 0x1a4   :  { %v1309_v37 = vadd.f32 %v2186_v8, %v1308_v32 }
 0x1a5   :  { %v1488_v21 = vpack.c.bf16 %v1465_v52, %v1464_v47 }
 0x1a6   :  { %v1313_v19 = vsel %vm1312_vm14, %v2186_v8, %v1309_v37 }
 0x1a7   :  { %v1318_v46 = vsel %vm1315_vm0, %v1317_v5, %v1313_v19 }
 0x1a8   :  { %1414 = vrot.lane.b32.xlu1 %v1318_v46, %s2188_s2  ;;  %1848 = vrot.lane.b32.xlu0 %v2058_v41, %s2190_s0 }
 0x1af   :  { %2041 = vmatmul.msk.bf16.gmra.mxu3 %vm266_vm2, %v1488_v21 }
 0x1b2   :  { %v1557_v54 = vpop.f32.mrf.mxu3  ;;  %v1389_v55 = vpop.permute.xlu0 %1388 }
 0x1b3   :  { %v1773_v58 = vadd.f32 %v2887_v40, %v1557_v54  ;;  %v1466_v24 = vmul.f32 %v1389_v55, %v2715_v23  ;;  %v1393_v23 = vpop.permute.xlu2 %1392 }
 0x1b4   :  { %v1468_v1 = vmul.f32 %v1393_v23, %v2728_v53 }
 0x1b5   :  { %1781 = vst.msk [vmem:[%s3557_s7] sm:$0xff] %vm266_vm2, %v1773_v58 }
 0x1ba   :  { %v1391_v61 = vpop.permute.xlu1 %1390  ;;  %v1559_v51 = vpop.f32.mrf.mxu3 }
 0x1bb   :  { %v1467_v57 = vmul.f32 %v1391_v61, %v2720_v48  ;;  %v1774_v63 = vadd.f32 %v2887_v40, %v1559_v51 }
 0x1bd   :  { %v1489_v56 = vpack.c.bf16 %v1467_v57, %v1466_v24  ;;  %1782 = vst.msk [vmem:[%s3557_s7 + $0x8] sm:$0xff] %vm266_vm2, %v1774_v63  ;;  %v1645_v63 = vld [vmem:[%s3556_s6 + $0x40] sm:$0xff] }
 0x1be   :  { %1689 = vst.msk [vmem:[%s3557_s7 + $0x40] sm:$0xff] %vm266_vm2, %v1645_v63 }
 0x1bf   :  { %2042 = vmatmul.msk.bf16.gmra.mxu3 %vm266_vm2, %v1489_v56  ;;  %1733 = vst.msk [vmem:[%s3557_s7 + $0x1a0] sm:$0xff] %vm266_vm2, %v1645_v63  ;;  %v3221_v63 = vld [vmem:[%s3556_s6 + $0x28] sm:$0xff] }
 0x1c0   :  { %1686 = vst.msk [vmem:[%s3557_s7 + $0x28] sm:$0xff] %vm266_vm2, %v3221_v63 }
 0x1c1   :  { %1730 = vst.msk [vmem:[%s3557_s7 + $0x188] sm:$0xff] %vm266_vm2, %v3221_v63 }
 0x1c2   :  { %v1562_v44 = vpop.f32.mrf.mxu3  ;;  %v1399_v62 = vpop.permute.xlu2 %1398 }
 0x1c3   :  { %v1775_v0 = vadd.f32 %v2887_v40, %v1562_v44  ;;  %v1471_v53 = vmul.f32 %v1399_v62, %v2752_v27 }
 0x1c5   :  { %1783 = vst.msk [vmem:[%s3557_s7 + $0x10] sm:$0xff] %vm266_vm2, %v1775_v0 }
 0x1ca   :  { %v1395_v48 = vpop.permute.xlu0 %1394  ;;  %v1564_v6 = vpop.f32.mrf.mxu3 }
 0x1cb   :  { %v1469_v34 = vmul.f32 %v1395_v48, %v2733_v38  ;;  %v1776_v3 = vadd.f32 %v2887_v40, %v1564_v6  ;;  %v1641_v6 = vld [vmem:[%s3556_s6 + $0x20] sm:$0xff] }
 0x1cc   :  { %1685 = vst.msk [vmem:[%s3557_s7 + $0x20] sm:$0xff] %vm266_vm2, %v1641_v6 }
 0x1cd   :  { %v1490_v29 = vpack.c.bf16 %v1469_v34, %v1468_v1  ;;  %1784 = vst.msk [vmem:[%s3557_s7 + $0x18] sm:$0xff] %vm266_vm2, %v1776_v3 }
 0x1ce   :  { %1729 = vst.msk [vmem:[%s3557_s7 + $0x180] sm:$0xff] %vm266_vm2, %v1641_v6 }
 0x1cf   :  { %2043 = vmatmul.msk.bf16.gmra.mxu3 %vm266_vm2, %v1490_v29  ;;  %v1647_v29 = vld [vmem:[%s3556_s6 + $0x50] sm:$0xff] }
 0x1d0   :  { %1691 = vst.msk [vmem:[%s3557_s7 + $0x50] sm:$0xff] %vm266_vm2, %v1647_v29 }
 0x1d1   :  { %1735 = vst.msk [vmem:[%s3557_s7 + $0x1b0] sm:$0xff] %vm266_vm2, %v1647_v29  ;;  %v1658_v29 = vld [vmem:[%s3556_s6 + $0xa8] sm:$0xff] }
 0x1d2   :  { %v1567_v13 = vpop.f32.mrf.mxu3  ;;  %v1397_v30 = vpop.permute.xlu1 %1396  ;;  %1702 = vst.msk [vmem:[%s3557_s7 + $0xa8] sm:$0xff] %vm266_vm2, %v1658_v29 }
 0x1d3   :  { %v1470_v7 = vmul.f32 %v1397_v30, %v2744_v26  ;;  %v1653_v30 = vld [vmem:[%s3556_s6 + $0x80] sm:$0xff]  ;;  %1746 = vst.msk [vmem:[%s3557_s7 + $0x208] sm:$0xff] %vm266_vm2, %v1658_v29 }
 0x1d4   :  { %1697 = vst.msk [vmem:[%s3557_s7 + $0x80] sm:$0xff] %vm266_vm2, %v1653_v30 }
 0x1d5   :  { %v1491_v59 = vpack.c.bf16 %v1471_v53, %v1470_v7  ;;  %1741 = vst.msk [vmem:[%s3557_s7 + $0x1e0] sm:$0xff] %vm266_vm2, %v1653_v30  ;;  %v1660_v30 = vld [vmem:[%s3556_s6 + $0xb8] sm:$0xff] }
 0x1d6   :  { %1704 = vst.msk [vmem:[%s3557_s7 + $0xb8] sm:$0xff] %vm266_vm2, %v1660_v30 }
 0x1d7   :  { %1748 = vst.msk [vmem:[%s3557_s7 + $0x218] sm:$0xff] %vm266_vm2, %v1660_v30 }
 0x1da   :  { %v1569_v22 = vpop.f32.mrf.mxu3  ;;  %v1405_v39 = vpop.permute.xlu2 %1404 }
 0x1db   :  { %v1474_v50 = vmul.f32 %v1405_v39, %v2784_v2  ;;  %v1657_v39 = vld [vmem:[%s3556_s6 + $0xa0] sm:$0xff] }
 0x1dc   :  { %1701 = vst.msk [vmem:[%s3557_s7 + $0xa0] sm:$0xff] %vm266_vm2, %v1657_v39 }
 0x1dd   :  { %1745 = vst.msk [vmem:[%s3557_s7 + $0x200] sm:$0xff] %vm266_vm2, %v1657_v39  ;;  %v1671_v39 = vld [vmem:[%s3556_s6 + $0x110] sm:$0xff] }
 0x1de   :  { %1715 = vst.msk [vmem:[%s3557_s7 + $0x110] sm:$0xff] %vm266_vm2, %v1671_v39 }
 0x1df   :  { %2044 = vmatmul.msk.bf16.gmra.mxu3 %vm266_vm2, %v1491_v59  ;;  %1759 = vst.msk [vmem:[%s3557_s7 + $0x270] sm:$0xff] %vm266_vm2, %v1671_v39 }
 0x1e2   :  { %v1572_v38 = vpop.f32.mrf.mxu3  ;;  %v1401_v10 = vpop.permute.xlu0 %1400 }
 0x1e3   :  { %v1472_v12 = vmul.f32 %v1401_v10, %v2764_v11 }
 0x1ea   :  { %v1403_v43 = vpop.permute.xlu1 %1402  ;;  %v1574_v8 = vpop.f32.mrf.mxu3 }
 0x1eb   :  { %v1473_v15 = vmul.f32 %v1403_v43, %v2771_v45 }
 0x1ed   :  { %v1492_v17 = vpack.c.bf16 %v1473_v15, %v1472_v12  ;;  %v1649_v15 = vld [vmem:[%s3556_s6 + $0x60] sm:$0xff] }
 0x1ee   :  { %1693 = vst.msk [vmem:[%s3557_s7 + $0x60] sm:$0xff] %vm266_vm2, %v1649_v15 }
 0x1ef   :  { %2045 = vmatmul.msk.bf16.gmra.mxu3 %vm266_vm2, %v1492_v17  ;;  %1737 = vst.msk [vmem:[%s3557_s7 + $0x1c0] sm:$0xff] %vm266_vm2, %v1649_v15  ;;  %v1674_v15 = vld [vmem:[%s3556_s6 + $0x128] sm:$0xff] }
 0x1f0   :  { %1718 = vst.msk [vmem:[%s3557_s7 + $0x128] sm:$0xff] %vm266_vm2, %v1674_v15 }
 0x1f1   :  { %1762 = vst.msk [vmem:[%s3557_s7 + $0x288] sm:$0xff] %vm266_vm2, %v1674_v15 }
 0x1f2   :  { %v1411_v18 = vpop.permute.xlu2 %1410  ;;  %v1577_v26 = vpop.f32.mrf.mxu3 }
 0x1f3   :  { %v1477_v5 = vmul.f32 %v1411_v18, %v2807_v42  ;;  %v1669_v18 = vld [vmem:[%s3556_s6 + $0x100] sm:$0xff] }
 0x1f4   :  { %1713 = vst.msk [vmem:[%s3557_s7 + $0x100] sm:$0xff] %vm266_vm2, %v1669_v18 }
 0x1f5   :  { %1757 = vst.msk [vmem:[%s3557_s7 + $0x260] sm:$0xff] %vm266_vm2, %v1669_v18  ;;  %v1678_v18 = vld [vmem:[%s3556_s6 + $0x148] sm:$0xff] }
 0x1f6   :  { %1722 = vst.msk [vmem:[%s3557_s7 + $0x148] sm:$0xff] %vm266_vm2, %v1678_v18 }
 0x1f7   :  { %1766 = vst.msk [vmem:[%s3557_s7 + $0x2a8] sm:$0xff] %vm266_vm2, %v1678_v18 }
 0x1fa   :  { %v2923_v27 = vpop.permute.xlu2 %1793  ;;  %v1407_v4 = vpop.permute.xlu0 %1406 }
 0x1fb   :  { %v1579_v16 = vpop.f32.mrf.mxu3  ;;  %v1475_v25 = vmul.f32 %v1407_v4, %v2791_v14  ;;  %v1796_v28 = vadd.f32 %v2923_v27, %v1567_v13  ;;  %v1797_v11 = vadd.f32 %v2923_v27, %v1569_v22  ;;  %v1798_v45 = vadd.f32 %v2923_v27, %v1572_v38  ;;  %v1665_v22 = vld [vmem:[%s3556_s6 + $0xe0] sm:$0xff] }
 0x1fc   :  { %v1799_v33 = vadd.f32 %v2923_v27, %v1574_v8  ;;  %1709 = vst.msk [vmem:[%s3557_s7 + $0xe0] sm:$0xff] %vm266_vm2, %v1665_v22 }
 0x1fd   :  { %v1493_v32 = vpack.c.bf16 %v1475_v25, %v1474_v50  ;;  %1806 = vrot.lane.b32.xlu1 %v1796_v28, %s2188_s2  ;;  %1816 = vrot.lane.b32.xlu0 %v1797_v11, %s2188_s2  ;;  %1753 = vst.msk [vmem:[%s3557_s7 + $0x240] sm:$0xff] %vm266_vm2, %v1665_v22  ;;  %v1673_v25 = vld [vmem:[%s3556_s6 + $0x120] sm:$0xff] }
 0x1fe   :  { %1826 = vrot.lane.b32.xlu2 %v1798_v45, %s2188_s2  ;;  %1717 = vst.msk [vmem:[%s3557_s7 + $0x120] sm:$0xff] %vm266_vm2, %v1673_v25  ;;  %v1664_v22 = vld [vmem:[%s3556_s6 + $0xd8] sm:$0xff] }
 0x1ff   :  { %2046 = vmatmul.msk.bf16.gmra.mxu3 %vm266_vm2, %v1493_v32  ;;  %1761 = vst.msk [vmem:[%s3557_s7 + $0x280] sm:$0xff] %vm266_vm2, %v1673_v25 }
 0x200   :  { %1708 = vst.msk [vmem:[%s3557_s7 + $0xd8] sm:$0xff] %vm266_vm2, %v1664_v22 }
 0x201   :  { %1752 = vst.msk [vmem:[%s3557_s7 + $0x238] sm:$0xff] %vm266_vm2, %v1664_v22 }
 0x202   :  { %v1409_v14 = vpop.permute.xlu1 %1408 }
 0x203   :  { %v1582_v2 = vpop.f32.mrf.mxu3  ;;  %v1476_v36 = vmul.f32 %v1409_v14, %v2801_v35 }
 0x205   :  { %1836 = vrot.lane.b32.xlu1 %v1799_v33, %s2188_s2  ;;  %v1494_v41 = vpack.c.bf16 %v1477_v5, %v1476_v36 }
 0x20b   :  { %v1584_v37 = vpop.f32.mrf.mxu3 }
 0x20f   :  { %2047 = vmatmul.msk.bf16.gmra.mxu3 %vm266_vm2, %v1494_v41 }
 0x212   :  { %v1413_v31 = vpop.permute.xlu0 %1412 }
 0x213   :  { %v1587_v19 = vpop.f32.mrf.mxu3  ;;  %v1478_v9 = vmul.f32 %v1413_v31, %v2814_v20 }
 0x21a   :  { %v1415_v46 = vpop.permute.xlu1 %1414  ;;  %v2940_v52 = vpop.permute.xlu0 %1848 }
 0x21b   :  { %v1479_v47 = vmul.f32 %v1415_v46, %v2819_v60  ;;  %v1589_v49 = vpop.f32.mrf.mxu3  ;;  %v1853_v21 = vadd.f32 %v2940_v52, %v1582_v2  ;;  %v1852_v35 = vadd.f32 %v2940_v52, %v1579_v16  ;;  %v1851_v54 = vadd.f32 %v2940_v52, %v1577_v26 }
 0x21c   :  { %v1856_v60 = vadd.f32 %v2940_v52, %v1589_v49  ;;  %v1855_v58 = vadd.f32 %v2940_v52, %v1587_v19  ;;  %v1854_v55 = vadd.f32 %v2940_v52, %v1584_v37 }
 0x21d   :  { %v1495_v42 = vpack.c.bf16 %v1479_v47, %v1478_v9  ;;  %1889 = vrot.lane.b32.xlu1 %v1853_v21, %s2191_s30  ;;  %1879 = vrot.lane.b32.xlu2 %v1852_v35, %s2191_s30 }
 0x21e   :  { %1869 = vrot.lane.b32.xlu0 %v1851_v54, %s2191_s30 }
 0x21f   :  { %2048 = vmatmul.msk.bf16.gmra.mxu3 %vm266_vm2, %v1495_v42 }
 0x223   :  { %v1592_v20 = vpop.f32.mrf.mxu3 }
 0x224   :  { %v1857_v24 = vadd.f32 %v2940_v52, %v1592_v20 }
 0x225   :  { %1919 = vrot.lane.b32.xlu1 %v1856_v60, %s2191_s30  ;;  %1909 = vrot.lane.b32.xlu2 %v1855_v58, %s2191_s30  ;;  %v1677_v58 = vld [vmem:[%s3556_s6 + $0x140] sm:$0xff] }
 0x226   :  { %1899 = vrot.lane.b32.xlu0 %v1854_v55, %s2191_s30  ;;  %1721 = vst.msk [vmem:[%s3557_s7 + $0x140] sm:$0xff] %vm266_vm2, %v1677_v58 }
 0x227   :  { %1765 = vst.msk [vmem:[%s3557_s7 + $0x2a0] sm:$0xff] %vm266_vm2, %v1677_v58 }
 0x22b   :  { %v2955_v61 = vpop.f32.mrf.mxu3 }
 0x22c   :  { %v1858_v47 = vadd.f32 %v2940_v52, %v2955_v61 }
 0x22e   :  { %1929 = vrot.lane.b32.xlu0 %v1857_v24, %s2191_s30 }
 0x233   :  { %v1597_v57 = vpop.f32.mrf.mxu3 }
 0x234   :  { %v1777_v51 = vadd.f32 %v2887_v40, %v1597_v57 }
 0x236   :  { %1785 = vst.msk [vmem:[%s3557_s7 + $0x160] sm:$0xff] %vm266_vm2, %v1777_v51 }
 0x23b   :  { %v1599_v56 = vpop.f32.mrf.mxu3 }
 0x23c   :  { %v1778_v44 = vadd.f32 %v2887_v40, %v1599_v56  ;;  %v3226_v56 = vld [vmem:[%s3556_s6 + $0x38] sm:$0xff] }
 0x23d   :  { %1688 = vst.msk [vmem:[%s3557_s7 + $0x38] sm:$0xff] %vm266_vm2, %v3226_v56 }
 0x23e   :  { %1786 = vst.msk [vmem:[%s3557_s7 + $0x168] sm:$0xff] %vm266_vm2, %v1778_v44  ;;  %v1646_v44 = vld [vmem:[%s3556_s6 + $0x48] sm:$0xff] }
 0x23f   :  { %1690 = vst.msk [vmem:[%s3557_s7 + $0x48] sm:$0xff] %vm266_vm2, %v1646_v44 }
 0x240   :  { %1732 = vst.msk [vmem:[%s3557_s7 + $0x198] sm:$0xff] %vm266_vm2, %v3226_v56 }
 0x241   :  { %1734 = vst.msk [vmem:[%s3557_s7 + $0x1a8] sm:$0xff] %vm266_vm2, %v1646_v44 }
 0x243   :  { %v1602_v0 = vpop.f32.mrf.mxu3 }
 0x244   :  { %v1779_v23 = vadd.f32 %v2887_v40, %v1602_v0  ;;  %v1648_v0 = vld [vmem:[%s3556_s6 + $0x58] sm:$0xff] }
 0x245   :  { %1692 = vst.msk [vmem:[%s3557_s7 + $0x58] sm:$0xff] %vm266_vm2, %v1648_v0 }
 0x246   :  { %1787 = vst.msk [vmem:[%s3557_s7 + $0x170] sm:$0xff] %vm266_vm2, %v1779_v23  ;;  %v1650_v23 = vld [vmem:[%s3556_s6 + $0x68] sm:$0xff] }
 0x247   :  { %1694 = vst.msk [vmem:[%s3557_s7 + $0x68] sm:$0xff] %vm266_vm2, %v1650_v23 }
 0x248   :  { %1736 = vst.msk [vmem:[%s3557_s7 + $0x1b8] sm:$0xff] %vm266_vm2, %v1648_v0 }
 0x249   :  { %1738 = vst.msk [vmem:[%s3557_s7 + $0x1c8] sm:$0xff] %vm266_vm2, %v1650_v23 }
 0x24b   :  { %v1604_v48 = vpop.f32.mrf.mxu3 }
 0x24c   :  { %v1780_v1 = vadd.f32 %v2887_v40, %v1604_v48  ;;  %v1643_v40 = vld [vmem:[%s3556_s6 + $0x30] sm:$0xff] }
 0x24d   :  { %1687 = vst.msk [vmem:[%s3557_s7 + $0x30] sm:$0xff] %vm266_vm2, %v1643_v40  ;;  %v1651_v48 = vld [vmem:[%s3556_s6 + $0x70] sm:$0xff] }
 0x24e   :  { %1788 = vst.msk [vmem:[%s3557_s7 + $0x178] sm:$0xff] %vm266_vm2, %v1780_v1  ;;  %v1652_v1 = vld [vmem:[%s3556_s6 + $0x78] sm:$0xff] }
 0x24f   :  { %1731 = vst.msk [vmem:[%s3557_s7 + $0x190] sm:$0xff] %vm266_vm2, %v1643_v40  ;;  %v1654_v40 = vld [vmem:[%s3556_s6 + $0x88] sm:$0xff] }
 0x250   :  { %1695 = vst.msk [vmem:[%s3557_s7 + $0x70] sm:$0xff] %vm266_vm2, %v1651_v48 }
 0x251   :  { %1696 = vst.msk [vmem:[%s3557_s7 + $0x78] sm:$0xff] %vm266_vm2, %v1652_v1 }
 0x252   :  { %1698 = vst.msk [vmem:[%s3557_s7 + $0x88] sm:$0xff] %vm266_vm2, %v1654_v40 }
 0x253   :  { %v1607_v34 = vpop.f32.mrf.mxu3  ;;  %1739 = vst.msk [vmem:[%s3557_s7 + $0x1d0] sm:$0xff] %vm266_vm2, %v1651_v48 }
 0x254   :  { %v1800_v3 = vadd.f32 %v2923_v27, %v1607_v34  ;;  %v1655_v34 = vld [vmem:[%s3556_s6 + $0x90] sm:$0xff]  ;;  %1740 = vst.msk [vmem:[%s3557_s7 + $0x1d8] sm:$0xff] %vm266_vm2, %v1652_v1 }
 0x255   :  { %1699 = vst.msk [vmem:[%s3557_s7 + $0x90] sm:$0xff] %vm266_vm2, %v1655_v34 }
 0x256   :  { %1808 = vrot.lane.b32.xlu2 %v1800_v3, %s2188_s2  ;;  %v1656_v3 = vld [vmem:[%s3556_s6 + $0x98] sm:$0xff]  ;;  %1742 = vst.msk [vmem:[%s3557_s7 + $0x1e8] sm:$0xff] %vm266_vm2, %v1654_v40 }
 0x257   :  { %1700 = vst.msk [vmem:[%s3557_s7 + $0x98] sm:$0xff] %vm266_vm2, %v1656_v3 }
 0x258   :  { %v1827_v13 = vpop.permute.xlu2 %1826  ;;  %1743 = vst.msk [vmem:[%s3557_s7 + $0x1f0] sm:$0xff] %vm266_vm2, %v1655_v34 }
 0x259   :  { %1832 = vst.msk [vmem:[%s3557_s7 + $0x40] sm:$0xff] %vm266_vm2, %v1827_v13  ;;  %v1659_v13 = vld [vmem:[%s3556_s6 + $0xb0] sm:$0xff] }
 0x25a   :  { %1703 = vst.msk [vmem:[%s3557_s7 + $0xb0] sm:$0xff] %vm266_vm2, %v1659_v13 }
 0x25b   :  { %v1609_v62 = vpop.f32.mrf.mxu3  ;;  %1744 = vst.msk [vmem:[%s3557_s7 + $0x1f8] sm:$0xff] %vm266_vm2, %v1656_v3 }
 0x25c   :  { %v1801_v7 = vadd.f32 %v2923_v27, %v1609_v62  ;;  %v1662_v62 = vld [vmem:[%s3556_s6 + $0xc8] sm:$0xff]  ;;  %1747 = vst.msk [vmem:[%s3557_s7 + $0x210] sm:$0xff] %vm266_vm2, %v1659_v13 }
 0x25d   :  { %1706 = vst.msk [vmem:[%s3557_s7 + $0xc8] sm:$0xff] %vm266_vm2, %v1662_v62 }
 0x25e   :  { %1818 = vrot.lane.b32.xlu1 %v1801_v7, %s2188_s2  ;;  %v1663_v7 = vld [vmem:[%s3556_s6 + $0xd0] sm:$0xff]  ;;  %1750 = vst.msk [vmem:[%s3557_s7 + $0x228] sm:$0xff] %vm266_vm2, %v1662_v62 }
 0x25f   :  { %1707 = vst.msk [vmem:[%s3557_s7 + $0xd0] sm:$0xff] %vm266_vm2, %v1663_v7 }
 0x260   :  { %1751 = vst.msk [vmem:[%s3557_s7 + $0x230] sm:$0xff] %vm266_vm2, %v1663_v7 }
 0x263   :  { %v1612_v53 = vpop.f32.mrf.mxu3 }
 0x264   :  { %v1802_v59 = vadd.f32 %v2923_v27, %v1612_v53  ;;  %v1666_v53 = vld [vmem:[%s3556_s6 + $0xe8] sm:$0xff] }
 0x265   :  { %1710 = vst.msk [vmem:[%s3557_s7 + $0xe8] sm:$0xff] %vm266_vm2, %v1666_v53 }
 0x266   :  { %1828 = vrot.lane.b32.xlu0 %v1802_v59, %s2188_s2  ;;  %v1667_v59 = vld [vmem:[%s3556_s6 + $0xf0] sm:$0xff]  ;;  %1754 = vst.msk [vmem:[%s3557_s7 + $0x248] sm:$0xff] %vm266_vm2, %v1666_v53 }
 0x267   :  { %1711 = vst.msk [vmem:[%s3557_s7 + $0xf0] sm:$0xff] %vm266_vm2, %v1667_v59 }
 0x268   :  { %1755 = vst.msk [vmem:[%s3557_s7 + $0x250] sm:$0xff] %vm266_vm2, %v1667_v59 }
 0x26b   :  { %v1614_v38 = vpop.f32.mrf.mxu3 }
 0x26c   :  { %v1803_v10 = vadd.f32 %v2923_v27, %v1614_v38  ;;  %v1661_v27 = vld [vmem:[%s3556_s6 + $0xc0] sm:$0xff]  ;;  %v1668_v38 = vld [vmem:[%s3556_s6 + $0xf8] sm:$0xff] }
 0x26d   :  { %1705 = vst.msk [vmem:[%s3557_s7 + $0xc0] sm:$0xff] %vm266_vm2, %v1661_v27 }
 0x26e   :  { %1838 = vrot.lane.b32.xlu2 %v1803_v10, %s2188_s2  ;;  %1749 = vst.msk [vmem:[%s3557_s7 + $0x220] sm:$0xff] %vm266_vm2, %v1661_v27  ;;  %v1670_v10 = vld [vmem:[%s3556_s6 + $0x108] sm:$0xff] }
 0x26f   :  { %v1807_v43 = vpop.permute.xlu1 %1806  ;;  %v1817_v12 = vpop.permute.xlu0 %1816  ;;  %1712 = vst.msk [vmem:[%s3557_s7 + $0xf8] sm:$0xff] %vm266_vm2, %v1668_v38 }
 0x270   :  { %1812 = vst.msk [vmem:[%s3557_s7 + $0x20] sm:$0xff] %vm266_vm2, %v1807_v43  ;;  %v1672_v43 = vld [vmem:[%s3556_s6 + $0x118] sm:$0xff] }
 0x271   :  { %1822 = vst.msk [vmem:[%s3557_s7 + $0x30] sm:$0xff] %vm266_vm2, %v1817_v12 }
 0x272   :  { %1714 = vst.msk [vmem:[%s3557_s7 + $0x108] sm:$0xff] %vm266_vm2, %v1670_v10 }
 0x273   :  { %v1617_v8 = vpop.f32.mrf.mxu3  ;;  %1716 = vst.msk [vmem:[%s3557_s7 + $0x118] sm:$0xff] %vm266_vm2, %v1672_v43 }
 0x274   :  { %v1859_v17 = vadd.f32 %v2940_v52, %v1617_v8  ;;  %v1675_v8 = vld [vmem:[%s3556_s6 + $0x130] sm:$0xff]  ;;  %1756 = vst.msk [vmem:[%s3557_s7 + $0x258] sm:$0xff] %vm266_vm2, %v1668_v38 }
 0x275   :  { %1719 = vst.msk [vmem:[%s3557_s7 + $0x130] sm:$0xff] %vm266_vm2, %v1675_v8 }
 0x276   :  { %1871 = vrot.lane.b32.xlu1 %v1859_v17, %s2191_s30  ;;  %v1676_v17 = vld [vmem:[%s3556_s6 + $0x138] sm:$0xff]  ;;  %1758 = vst.msk [vmem:[%s3557_s7 + $0x268] sm:$0xff] %vm266_vm2, %v1670_v10 }
 0x277   :  { %v1837_v26 = vpop.permute.xlu1 %1836  ;;  %v1880_v50 = vpop.permute.xlu2 %1879  ;;  %1720 = vst.msk [vmem:[%s3557_s7 + $0x138] sm:$0xff] %vm266_vm2, %v1676_v17 }
 0x278   :  { %1842 = vst.msk [vmem:[%s3557_s7 + $0x50] sm:$0xff] %vm266_vm2, %v1837_v26  ;;  %v1679_v26 = vld [vmem:[%s3556_s6 + $0x150] sm:$0xff] }
 0x279   :  { %1885 = vst.msk [vmem:[%s3557_s7 + $0x80] sm:$0xff] %vm266_vm2, %v1880_v50  ;;  %v1680_v50 = vld [vmem:[%s3556_s6 + $0x158] sm:$0xff] }
 0x27a   :  { %1723 = vst.msk [vmem:[%s3557_s7 + $0x150] sm:$0xff] %vm266_vm2, %v1679_v26 }
 0x27b   :  { %v1619_v4 = vpop.f32.mrf.mxu3  ;;  %1724 = vst.msk [vmem:[%s3557_s7 + $0x158] sm:$0xff] %vm266_vm2, %v1680_v50 }
 0x27c   :  { %v1860_v16 = vadd.f32 %v2940_v52, %v1619_v4  ;;  %1760 = vst.msk [vmem:[%s3557_s7 + $0x278] sm:$0xff] %vm266_vm2, %v1672_v43 }
 0x27d   :  { %1763 = vst.msk [vmem:[%s3557_s7 + $0x290] sm:$0xff] %vm266_vm2, %v1675_v8 }
 0x27e   :  { %1881 = vrot.lane.b32.xlu0 %v1860_v16, %s2191_s30  ;;  %1764 = vst.msk [vmem:[%s3557_s7 + $0x298] sm:$0xff] %vm266_vm2, %v1676_v17 }
 0x27f   :  { %v1910_v28 = vpop.permute.xlu2 %1909  ;;  %1767 = vst.msk [vmem:[%s3557_s7 + $0x2b0] sm:$0xff] %vm266_vm2, %v1679_v26 }
 0x280   :  { %1915 = vst.msk [vmem:[%s3557_s7 + $0xe0] sm:$0xff] %vm266_vm2, %v1910_v28 }
 0x281   :  { %1768 = vst.msk [vmem:[%s3557_s7 + $0x2b8] sm:$0xff] %vm266_vm2, %v1680_v50 }
 0x283   :  { %v1622_v11 = vpop.f32.mrf.mxu3 }
 0x284   :  { %v1861_v45 = vadd.f32 %v2940_v52, %v1622_v11 }
 0x286   :  { %1891 = vrot.lane.b32.xlu2 %v1861_v45, %s2191_s30 }
 0x28b   :  { %v1624_v32 = vpop.f32.mrf.mxu3 }
 0x28c   :  { %v1862_v2 = vadd.f32 %v2940_v52, %v1624_v32 }
 0x28e   :  { %1901 = vrot.lane.b32.xlu1 %v1862_v2, %s2191_s30 }
 0x28f   :  { %v1890_v33 = vpop.permute.xlu1 %1889 }
 0x290   :  { %1895 = vst.msk [vmem:[%s3557_s7 + $0xa0] sm:$0xff] %vm266_vm2, %v1890_v33  ;;  %v1870_v14 = vpop.permute.xlu0 %1869 }
 0x291   :  { %1875 = vst.msk [vmem:[%s3557_s7 + $0x60] sm:$0xff] %vm266_vm2, %v1870_v14 }
 0x293   :  { %v1627_v36 = vpop.f32.mrf.mxu3 }
 0x294   :  { %v1863_v37 = vadd.f32 %v2940_v52, %v1627_v36 }
 0x296   :  { %1911 = vrot.lane.b32.xlu0 %v1863_v37, %s2191_s30 }
 0x297   :  { %v1920_v5 = vpop.permute.xlu1 %1919 }
 0x298   :  { %1925 = vst.msk [vmem:[%s3557_s7 + $0x100] sm:$0xff] %vm266_vm2, %v1920_v5  ;;  %v1900_v41 = vpop.permute.xlu0 %1899 }
 0x299   :  { %1905 = vst.msk [vmem:[%s3557_s7 + $0xc0] sm:$0xff] %vm266_vm2, %v1900_v41 }
 0x29b   :  { %v1629_v19 = vpop.f32.mrf.mxu3 }
 0x29c   :  { %v1864_v31 = vadd.f32 %v2940_v52, %v1629_v19 }
 0x29e   :  { %1921 = vrot.lane.b32.xlu2 %v1864_v31, %s2191_s30 }
 0x2a0   :  { %v1930_v46 = vpop.permute.xlu0 %1929 }
 0x2a1   :  { %1935 = vst.msk [vmem:[%s3557_s7 + $0x120] sm:$0xff] %vm266_vm2, %v1930_v46 }
 0x2a3   :  { %v1632_v9 = vpop.f32.mrf.mxu3 }
 0x2a4   :  { %v1865_v49 = vadd.f32 %v2940_v52, %v1632_v9 }
 0x2a6   :  { %1931 = vrot.lane.b32.xlu1 %v1865_v49, %s2191_s30  ;;  %1939 = vrot.lane.b32.xlu2 %v1858_v47, %s2191_s30 }
 0x2ab   :  { %v1634_v21 = vpop.f32.mrf.mxu3 }
 0x2ac   :  { %v1866_v35 = vadd.f32 %v2940_v52, %v1634_v21 }
 0x2ae   :  { %1941 = vrot.lane.b32.xlu0 %v1866_v35, %s2191_s30 }
 0x2b0   :  { %v1809_v54 = vpop.permute.xlu2 %1808 }
 0x2b1   :  { %1813 = vst.msk [vmem:[%s3557_s7 + $0x180] sm:$0xff] %vm266_vm2, %v1809_v54 }
 0x2c8   :  { %v1839_v42 = vpop.permute.xlu2 %1838 }
 0x2c9   :  { %1843 = vst.msk [vmem:[%s3557_s7 + $0x1b0] sm:$0xff] %vm266_vm2, %v1839_v42 }
 0x2d0   :  { %v1819_v20 = vpop.permute.xlu1 %1818 }
 0x2d1   :  { %1823 = vst.msk [vmem:[%s3557_s7 + $0x190] sm:$0xff] %vm266_vm2, %v1819_v20 }
 0x2d8   :  { %v1829_v52 = vpop.permute.xlu0 %1828 }
 0x2d9   :  { %1833 = vst.msk [vmem:[%s3557_s7 + $0x1a0] sm:$0xff] %vm266_vm2, %v1829_v52 }
 0x2e0   :  { %v1892_v60 = vpop.permute.xlu2 %1891 }
 0x2e1   :  { %1896 = vst.msk [vmem:[%s3557_s7 + $0x200] sm:$0xff] %vm266_vm2, %v1892_v60 }
 0x2e8   :  { %v1872_v55 = vpop.permute.xlu1 %1871 }
 0x2e9   :  { %1876 = vst.msk [vmem:[%s3557_s7 + $0x1c0] sm:$0xff] %vm266_vm2, %v1872_v55 }
 0x2f0   :  { %v1882_v61 = vpop.permute.xlu0 %1881 }
 0x2f1   :  { %1886 = vst.msk [vmem:[%s3557_s7 + $0x1e0] sm:$0xff] %vm266_vm2, %v1882_v61 }
 0x2f8   :  { %v1922_v24 = vpop.permute.xlu2 %1921 }
 0x2f9   :  { %1926 = vst.msk [vmem:[%s3557_s7 + $0x260] sm:$0xff] %vm266_vm2, %v1922_v24 }
 0x300   :  { %v1902_v57 = vpop.permute.xlu1 %1901  ;;  %v1940_v51 = vpop.permute.xlu2 %1939 }
 0x301   :  { %1906 = vst.msk [vmem:[%s3557_s7 + $0x220] sm:$0xff] %vm266_vm2, %v1902_v57 }
 0x302   :  { %1945 = vst.msk [vmem:[%s3557_s7 + $0x140] sm:$0xff] %vm266_vm2, %v1940_v51 }
 0x308   :  { %v1912_v6 = vpop.permute.xlu0 %1911 }
 0x309   :  { %1916 = vst.msk [vmem:[%s3557_s7 + $0x240] sm:$0xff] %vm266_vm2, %v1912_v6 }
 0x318   :  { %v1932_v12 = vpop.permute.xlu1 %1931 }
 0x319   :  { %1936 = vst.msk [vmem:[%s3557_s7 + $0x280] sm:$0xff] %vm266_vm2, %v1932_v12 }
 0x320   :  { %v1942_v27 = vpop.permute.xlu0 %1941 }
 0x321   :  { %1946 = vst.msk [vmem:[%s3557_s7 + $0x2a0] sm:$0xff] %vm266_vm2, %v1942_v27 }

</bundles_post_ra>
